<compile_context>
chip_gen: v6e
topology: v6e:2x2x1
jax: 0.10.0
libtpu: 0.0.40
codegen_flags: <defaults>
</compile_context>

<pallas_src>
import functools

import jax
import jax.numpy as jnp
from jax.experimental import pallas as pl
from jax.experimental.pallas import tpu as pltpu

_LANE = 128
_SUBLANE = 8


def _round_up(x, m):
    return (x + m - 1) // m * m


def _conv_relu_kernel(x_ref, w_ref, b_ref, o_ref, patch_ref, *,
                      kh_size, kw_size, k_real):
    """One (batch, cout-tile, row-tile) grid step.

    x_ref:     (1, Hp, Wp, Cin)      whole padded image (resident across c, r)
    w_ref:     (K_pad, TCOUT)        folded weight tile (resident across r)
    b_ref:     (1, TCOUT)            bias tile
    o_ref:     (1, TOH, OW, TCOUT)   output tile (lane-dense last dim)
    patch_ref: (TOH, OW, K_pad)      im2col staging scratch (VMEM)
    """
    _, toh, ow, tcout = o_ref.shape
    _, hp, wp, cin = x_ref.shape
    k_pad = patch_ref.shape[-1]

    r = pl.program_id(2)
    h0 = pl.multiple_of(r * toh, toh)          # first output row of this tile

    # Zero the K-padding tail so padded contraction lanes contribute exactly 0
    # (matching weight rows are zero too); keeps the MXU LHS loads unmasked at
    # K_pad = multiple of 128.
    if k_pad > k_real:
        patch_ref[:, :, k_real:] = jnp.zeros(
            (toh, ow, k_pad - k_real), patch_ref.dtype)

    # Stage the KH*KW taps once into the im2col scratch, then ONE fused MXU
    # matmul (never per-tap K=Cin dots).
    # TODO(synk): for Cin < 128 these tap copies are lane-masked stores; a
    # fully lane-dense staging needs W*Cin folded into the lane axis and only
    # pays off at real GoogleNet channel counts (Cin >= 64).
    for kh in range(kh_size):
        for kw in range(kw_size):
            col = (kh * kw_size + kw) * cin
            patch_ref[:, :, col:col + cin] = (
                x_ref[0, pl.ds(h0 + kh, toh), kw:kw + ow, :])

    patch = patch_ref[...].reshape(toh * ow, k_pad)
    acc = jnp.dot(patch, w_ref[...], preferred_element_type=jnp.float32)
    acc = jnp.maximum(acc + b_ref[...], 0.0)                 # bias + ReLU
    o_ref[...] = acc.reshape(1, toh, ow, tcout).astype(o_ref.dtype)


def _pick_row_tile(oh, fixed_bytes, per_row_bytes, budget_bytes):
    """Largest divisor of OH whose VMEM working set fits the budget."""
    for cand in range(oh, 0, -1):
        if oh % cand:
            continue
        if fixed_bytes + cand * per_row_bytes <= budget_bytes:
            return cand
    return 1


def basic_conv2d(x_nchw, weight_oihw, bias, *, padding=1,
                 compute_dtype=jnp.float32):
    """Conv2d(stride=1, padding=padding) + ReLU, matching nn.Conv2d semantics.

    x_nchw:      (N, Cin, H, W)
    weight_oihw: (Cout, Cin, KH, KW)   (PyTorch layout)
    bias:        (Cout,)
    returns:     (N, Cout, OH, OW)

    compute_dtype=jnp.bfloat16 is the production default choice (halves DMA
    bytes, doubles MXU rate; accumulation stays f32 via
    preferred_element_type); f32 here for exact parity with the reference.
    """
    N, Cin, H, W = x_nchw.shape
    Cout, wc_in, KH, KW = weight_oihw.shape
    assert wc_in == Cin, "grouped conv not supported"  # TODO(synk): groups

    out_dtype = x_nchw.dtype
    itemsize = jnp.dtype(compute_dtype).itemsize

    # NCHW -> NHWC + spatial zero padding.  Interface glue for the PyTorch
    # layout; see module-level TODO about keeping activations NHWC end-to-end.
    x = jnp.transpose(x_nchw, (0, 2, 3, 1)).astype(compute_dtype)
    xp = jnp.pad(x, ((0, 0), (padding, padding), (padding, padding), (0, 0)))
    Hp, Wp = H + 2 * padding, W + 2 * padding
    OH, OW = Hp - KH + 1, Wp - KW + 1

    # Cout tile: 256 when it divides evenly (fills the 2x256x256 MXU on
    # v6e/v7x, halves the Cout grid extent), else 128 (v5e MXU width / lane).
    Cout_pad = _round_up(Cout, _LANE)
    tcout = 256 if Cout_pad % 256 == 0 else _LANE

    # Fold weights for the single im2col matmul: (K_pad, Cout_pad) with K and
    # Cout zero-padded (padded K rows are zero => no contribution).
    K = KH * KW * Cin
    K_pad = _round_up(K, _LANE)
    w = jnp.transpose(weight_oihw, (2, 3, 1, 0)).reshape(K, Cout)
    w = jnp.pad(w.astype(compute_dtype),
                ((0, K_pad - K), (0, Cout_pad - Cout)))
    b = jnp.pad(bias.astype(jnp.float32),
                (0, Cout_pad - Cout)).reshape(1, Cout_pad)

    # Row tile: largest divisor of OH fitting the VMEM budget (double-buffered
    # image + weight tiles are the fixed part; patch scratch + output tile
    # scale with TOH).
    img_bytes = 2 * Hp * _round_up(Wp, _SUBLANE) * _round_up(Cin, _LANE) * itemsize
    wgt_bytes = 2 * K_pad * tcout * itemsize + 2 * tcout * 4
    fixed_bytes = img_bytes + wgt_bytes
    per_row_bytes = (_round_up(OW, _SUBLANE) * K_pad * itemsize            # patch
                     + 2 * _round_up(OW, _SUBLANE) * tcout * itemsize)     # out (x2)
    TOH = _pick_row_tile(OH, fixed_bytes, per_row_bytes, budget_bytes=40 << 20)

    n_row = OH // TOH
    n_cout = Cout_pad // tcout
    grid = (N, n_cout, n_row)          # weight resident across the inner row axis

    est_vmem = fixed_bytes + TOH * per_row_bytes
    vmem_limit = int(min(60 << 20, max(32 << 20, est_vmem + (8 << 20))))

    kernel = functools.partial(_conv_relu_kernel, kh_size=KH, kw_size=KW,
                               k_real=K)

    cost = pl.CostEstimate(
        flops=2 * N * OH * OW * K * Cout_pad,
        transcendentals=0,
        bytes_accessed=(xp.size * itemsize + w.size * itemsize + b.size * 4
                        + N * OH * OW * Cout_pad * jnp.dtype(out_dtype).itemsize))

    out_nhwc = pl.pallas_call(
        kernel,
        out_shape=jax.ShapeDtypeStruct((N, OH, OW, Cout_pad), out_dtype),
        grid_spec=pltpu.PrefetchScalarGridSpec(
            num_scalar_prefetch=0,
            grid=grid,
            in_specs=[
                # Whole padded image per batch element; constant across the
                # cout/row axes so it is DMA'd once per n and stays resident.
                pl.BlockSpec((1, Hp, Wp, Cin), lambda n, c, r: (n, 0, 0, 0)),
                # Weight/bias tiles: constant across the inner row axis, so
                # each Cout tile is fetched once per (n, c), not once per row.
                pl.BlockSpec((K_pad, tcout), lambda n, c, r: (0, c)),
                pl.BlockSpec((1, tcout), lambda n, c, r: (0, c)),
            ],
            out_specs=pl.BlockSpec((1, TOH, OW, tcout),
                                   lambda n, c, r: (n, r, 0, c)),
            scratch_shapes=[pltpu.VMEM((TOH, OW, K_pad), compute_dtype)],
        ),
        compiler_params=pltpu.CompilerParams(
            dimension_semantics=("parallel", "parallel", "parallel"),
            vmem_limit_bytes=vmem_limit),
        cost_estimate=cost,
    )(xp, w, b)

    # Drop the Cout padding, return PyTorch-style NCHW.
    return jnp.transpose(out_nhwc[..., :Cout], (0, 3, 1, 2))


def _reference(x_nchw, weight_oihw, bias, *, padding=1):
    out = jax.lax.conv_general_dilated(
        x_nchw, weight_oihw,
        window_strides=(1, 1),
        padding=[(padding, padding), (padding, padding)],
        dimension_numbers=("NCHW", "OIHW", "NCHW"))
    out = out + bias[None, :, None, None]
    return jnp.maximum(out, 0.0)


if __name__ == "__main__":
    # Shapes consistent with BasicConv2d(in_channels=4, out_channels=8,
    # kernel_size=3, padding=1) on an NCHW input.
    N, Cin, H, W = 2, 4, 16, 16
    Cout, KH, KW = 8, 3, 3

    key = jax.random.PRNGKey(0)
    kx, kwt, kb = jax.random.split(key, 3)
    x = jax.random.normal(kx, (N, Cin, H, W), dtype=jnp.float32)
    weight = jax.random.normal(kwt, (Cout, Cin, KH, KW), dtype=jnp.float32) * 0.1
    bias = jax.random.normal(kb, (Cout,), dtype=jnp.float32) * 0.1

    out = jax.block_until_ready(basic_conv2d(x, weight, bias, padding=1))
    ref = jax.block_until_ready(_reference(x, weight, bias, padding=1))

    assert out.shape == (N, Cout, H, W), out.shape
    assert jnp.allclose(out, ref, atol=1e-4, rtol=1e-4), "mismatch vs reference"

    print("KERNEL_OK")
</pallas_src>

<mosaic_0001>
module attributes {stable_mosaic.version = 11 : i64} {
  func.func @_conv_relu_kernel(%arg0: i32, %arg1: i32, %arg2: i32, %arg3: memref<1x18x18x4xf32, #tpu.memory_space<vmem>>, %arg4: memref<128x128xf32, #tpu.memory_space<vmem>>, %arg5: memref<1x128xf32, #tpu.memory_space<vmem>>, %arg6: memref<1x16x16x128xf32, #tpu.memory_space<vmem>>, %arg7: memref<16x16x128xf32, #tpu.memory_space<vmem>>) attributes {dimension_semantics = [#tpu.dimension_semantics<parallel>, #tpu.dimension_semantics<parallel>, #tpu.dimension_semantics<parallel>], iteration_bounds = array<i64: 2, 1, 1>, scalar_prefetch = 0 : i64, scratch_operands = 1 : i64, tpu.core_type = #tpu.core_type<tc>, window_params = [{transform_indices = @transform_0, window_bounds = array<i64: 1, 18, 18, 4>}, {transform_indices = @transform_1, window_bounds = array<i64: 128, 128>}, {transform_indices = @transform_2, window_bounds = array<i64: 1, 128>}, {transform_indices = @transform_3, window_bounds = array<i64: 1, 16, 16, 128>}]} {
    %c16_i32 = arith.constant 16 : i32
    %0 = arith.muli %arg2, %c16_i32 : i32
    %1 = tpu.assume_multiple %0, 16 : i32
    %cst = arith.constant 0.000000e+00 : f32
    %2 = vector.broadcast %cst : f32 to vector<16x16x92xf32>
    %c0 = arith.constant 0 : index
    %c0_0 = arith.constant 0 : index
    %c36 = arith.constant 36 : index
    %3 = vector.load %arg7[%c0, %c0_0, %c36] : memref<16x16x128xf32, #tpu.memory_space<vmem>>, vector<16x16x92xf32>
    tpu.vector_store %arg7[%c0, %c0_0, %c36], %2 {strides = array<i32>} : memref<16x16x128xf32, #tpu.memory_space<vmem>>, vector<16x16x92xf32>,
    %c0_i32 = arith.constant 0 : i32
    %4 = arith.addi %1, %c0_i32 : i32
    %c0_1 = arith.constant 0 : index
    %5 = arith.index_cast %4 : i32 to index
    %c0_2 = arith.constant 0 : index
    %c0_3 = arith.constant 0 : index
    %6 = vector.load %arg3[%c0_1, %5, %c0_2, %c0_3] : memref<1x18x18x4xf32, #tpu.memory_space<vmem>>, vector<1x16x16x4xf32>
    %7 = vector.shape_cast %6 : vector<1x16x16x4xf32> to vector<16x16x4xf32>
    %c0_4 = arith.constant 0 : index
    %c0_5 = arith.constant 0 : index
    %c0_6 = arith.constant 0 : index
    %8 = vector.load %arg7[%c0_4, %c0_5, %c0_6] : memref<16x16x128xf32, #tpu.memory_space<vmem>>, vector<16x16x4xf32>
    tpu.vector_store %arg7[%c0_4, %c0_5, %c0_6], %7 {strides = array<i32>} : memref<16x16x128xf32, #tpu.memory_space<vmem>>, vector<16x16x4xf32>,
    %c0_i32_7 = arith.constant 0 : i32
    %9 = arith.addi %1, %c0_i32_7 : i32
    %c0_8 = arith.constant 0 : index
    %10 = arith.index_cast %9 : i32 to index
    %c1 = arith.constant 1 : index
    %c0_9 = arith.constant 0 : index
    %11 = vector.load %arg3[%c0_8, %10, %c1, %c0_9] : memref<1x18x18x4xf32, #tpu.memory_space<vmem>>, vector<1x16x16x4xf32>
    %12 = vector.shape_cast %11 : vector<1x16x16x4xf32> to vector<16x16x4xf32>
    %c0_10 = arith.constant 0 : index
    %c0_11 = arith.constant 0 : index
    %c4 = arith.constant 4 : index
    %13 = vector.load %arg7[%c0_10, %c0_11, %c4] : memref<16x16x128xf32, #tpu.memory_space<vmem>>, vector<16x16x4xf32>
    tpu.vector_store %arg7[%c0_10, %c0_11, %c4], %12 {strides = array<i32>} : memref<16x16x128xf32, #tpu.memory_space<vmem>>, vector<16x16x4xf32>,
    %c0_i32_12 = arith.constant 0 : i32
    %14 = arith.addi %1, %c0_i32_12 : i32
    %c0_13 = arith.constant 0 : index
    %15 = arith.index_cast %14 : i32 to index
    %c2 = arith.constant 2 : index
    %c0_14 = arith.constant 0 : index
    %16 = vector.load %arg3[%c0_13, %15, %c2, %c0_14] : memref<1x18x18x4xf32, #tpu.memory_space<vmem>>, vector<1x16x16x4xf32>
    %17 = vector.shape_cast %16 : vector<1x16x16x4xf32> to vector<16x16x4xf32>
    %c0_15 = arith.constant 0 : index
    %c0_16 = arith.constant 0 : index
    %c8 = arith.constant 8 : index
    %18 = vector.load %arg7[%c0_15, %c0_16, %c8] : memref<16x16x128xf32, #tpu.memory_space<vmem>>, vector<16x16x4xf32>
    tpu.vector_store %arg7[%c0_15, %c0_16, %c8], %17 {strides = array<i32>} : memref<16x16x128xf32, #tpu.memory_space<vmem>>, vector<16x16x4xf32>,
    %c1_i32 = arith.constant 1 : i32
    %19 = arith.addi %1, %c1_i32 : i32
    %c0_17 = arith.constant 0 : index
    %20 = arith.index_cast %19 : i32 to index
    %c0_18 = arith.constant 0 : index
    %c0_19 = arith.constant 0 : index
    %21 = vector.load %arg3[%c0_17, %20, %c0_18, %c0_19] : memref<1x18x18x4xf32, #tpu.memory_space<vmem>>, vector<1x16x16x4xf32>
    %22 = vector.shape_cast %21 : vector<1x16x16x4xf32> to vector<16x16x4xf32>
    %c0_20 = arith.constant 0 : index
    %c0_21 = arith.constant 0 : index
    %c12 = arith.constant 12 : index
    %23 = vector.load %arg7[%c0_20, %c0_21, %c12] : memref<16x16x128xf32, #tpu.memory_space<vmem>>, vector<16x16x4xf32>
    tpu.vector_store %arg7[%c0_20, %c0_21, %c12], %22 {strides = array<i32>} : memref<16x16x128xf32, #tpu.memory_space<vmem>>, vector<16x16x4xf32>,
    %c1_i32_22 = arith.constant 1 : i32
    %24 = arith.addi %1, %c1_i32_22 : i32
    %c0_23 = arith.constant 0 : index
    %25 = arith.index_cast %24 : i32 to index
    %c1_24 = arith.constant 1 : index
    %c0_25 = arith.constant 0 : index
    %26 = vector.load %arg3[%c0_23, %25, %c1_24, %c0_25] : memref<1x18x18x4xf32, #tpu.memory_space<vmem>>, vector<1x16x16x4xf32>
    %27 = vector.shape_cast %26 : vector<1x16x16x4xf32> to vector<16x16x4xf32>
    %c0_26 = arith.constant 0 : index
    %c0_27 = arith.constant 0 : index
    %c16 = arith.constant 16 : index
    %28 = vector.load %arg7[%c0_26, %c0_27, %c16] : memref<16x16x128xf32, #tpu.memory_space<vmem>>, vector<16x16x4xf32>
    tpu.vector_store %arg7[%c0_26, %c0_27, %c16], %27 {strides = array<i32>} : memref<16x16x128xf32, #tpu.memory_space<vmem>>, vector<16x16x4xf32>,
    %c1_i32_28 = arith.constant 1 : i32
    %29 = arith.addi %1, %c1_i32_28 : i32
    %c0_29 = arith.constant 0 : index
    %30 = arith.index_cast %29 : i32 to index
    %c2_30 = arith.constant 2 : index
    %c0_31 = arith.constant 0 : index
    %31 = vector.load %arg3[%c0_29, %30, %c2_30, %c0_31] : memref<1x18x18x4xf32, #tpu.memory_space<vmem>>, vector<1x16x16x4xf32>
    %32 = vector.shape_cast %31 : vector<1x16x16x4xf32> to vector<16x16x4xf32>
    %c0_32 = arith.constant 0 : index
    %c0_33 = arith.constant 0 : index
    %c20 = arith.constant 20 : index
    %33 = vector.load %arg7[%c0_32, %c0_33, %c20] : memref<16x16x128xf32, #tpu.memory_space<vmem>>, vector<16x16x4xf32>
    tpu.vector_store %arg7[%c0_32, %c0_33, %c20], %32 {strides = array<i32>} : memref<16x16x128xf32, #tpu.memory_space<vmem>>, vector<16x16x4xf32>,
    %c2_i32 = arith.constant 2 : i32
    %34 = arith.addi %1, %c2_i32 : i32
    %c0_34 = arith.constant 0 : index
    %35 = arith.index_cast %34 : i32 to index
    %c0_35 = arith.constant 0 : index
    %c0_36 = arith.constant 0 : index
    %36 = vector.load %arg3[%c0_34, %35, %c0_35, %c0_36] : memref<1x18x18x4xf32, #tpu.memory_space<vmem>>, vector<1x16x16x4xf32>
    %37 = vector.shape_cast %36 : vector<1x16x16x4xf32> to vector<16x16x4xf32>
    %c0_37 = arith.constant 0 : index
    %c0_38 = arith.constant 0 : index
    %c24 = arith.constant 24 : index
    %38 = vector.load %arg7[%c0_37, %c0_38, %c24] : memref<16x16x128xf32, #tpu.memory_space<vmem>>, vector<16x16x4xf32>
    tpu.vector_store %arg7[%c0_37, %c0_38, %c24], %37 {strides = array<i32>} : memref<16x16x128xf32, #tpu.memory_space<vmem>>, vector<16x16x4xf32>,
    %c2_i32_39 = arith.constant 2 : i32
    %39 = arith.addi %1, %c2_i32_39 : i32
    %c0_40 = arith.constant 0 : index
    %40 = arith.index_cast %39 : i32 to index
    %c1_41 = arith.constant 1 : index
    %c0_42 = arith.constant 0 : index
    %41 = vector.load %arg3[%c0_40, %40, %c1_41, %c0_42] : memref<1x18x18x4xf32, #tpu.memory_space<vmem>>, vector<1x16x16x4xf32>
    %42 = vector.shape_cast %41 : vector<1x16x16x4xf32> to vector<16x16x4xf32>
    %c0_43 = arith.constant 0 : index
    %c0_44 = arith.constant 0 : index
    %c28 = arith.constant 28 : index
    %43 = vector.load %arg7[%c0_43, %c0_44, %c28] : memref<16x16x128xf32, #tpu.memory_space<vmem>>, vector<16x16x4xf32>
    tpu.vector_store %arg7[%c0_43, %c0_44, %c28], %42 {strides = array<i32>} : memref<16x16x128xf32, #tpu.memory_space<vmem>>, vector<16x16x4xf32>,
    %c2_i32_45 = arith.constant 2 : i32
    %44 = arith.addi %1, %c2_i32_45 : i32
    %c0_46 = arith.constant 0 : index
    %45 = arith.index_cast %44 : i32 to index
    %c2_47 = arith.constant 2 : index
    %c0_48 = arith.constant 0 : index
    %46 = vector.load %arg3[%c0_46, %45, %c2_47, %c0_48] : memref<1x18x18x4xf32, #tpu.memory_space<vmem>>, vector<1x16x16x4xf32>
    %47 = vector.shape_cast %46 : vector<1x16x16x4xf32> to vector<16x16x4xf32>
    %c0_49 = arith.constant 0 : index
    %c0_50 = arith.constant 0 : index
    %c32 = arith.constant 32 : index
    %48 = vector.load %arg7[%c0_49, %c0_50, %c32] : memref<16x16x128xf32, #tpu.memory_space<vmem>>, vector<16x16x4xf32>
    tpu.vector_store %arg7[%c0_49, %c0_50, %c32], %47 {strides = array<i32>} : memref<16x16x128xf32, #tpu.memory_space<vmem>>, vector<16x16x4xf32>,
    %c0_51 = arith.constant 0 : index
    %c0_52 = arith.constant 0 : index
    %c0_53 = arith.constant 0 : index
    %49 = vector.load %arg7[%c0_51, %c0_52, %c0_53] : memref<16x16x128xf32, #tpu.memory_space<vmem>>, vector<16x16x128xf32>
    %50 = vector.shape_cast %49 : vector<16x16x128xf32> to vector<256x128xf32>
    %c0_54 = arith.constant 0 : index
    %c0_55 = arith.constant 0 : index
    %51 = vector.load %arg4[%c0_54, %c0_55] : memref<128x128xf32, #tpu.memory_space<vmem>>, vector<128x128xf32>
    %cst_56 = arith.constant dense<0.000000e+00> : vector<256x128xf32>
    %52 = tpu.matmul %50, %51, %cst_56 {dimension_numbers = #tpu.dot_dimension_numbers<[1], [0], [0], [1], [0, 0, 1, 1], [], []>} : vector<256x128xf32>, vector<128x128xf32>, vector<256x128xf32> -> vector<256x128xf32>
    %c0_57 = arith.constant 0 : index
    %c0_58 = arith.constant 0 : index
    %53 = vector.load %arg5[%c0_57, %c0_58] : memref<1x128xf32, #tpu.memory_space<vmem>>, vector<1x128xf32>
    %54 = vector.broadcast %53 : vector<1x128xf32> to vector<256x128xf32>
    %55 = arith.addf %52, %54 : vector<256x128xf32>
    %cst_59 = arith.constant 0.000000e+00 : f32
    %56 = vector.broadcast %cst_59 : f32 to vector<256x128xf32>
    %57 = arith.maximumf %55, %56 : vector<256x128xf32>
    %58 = vector.shape_cast %57 : vector<256x128xf32> to vector<1x16x16x128xf32>
    %c0_60 = arith.constant 0 : index
    %c0_61 = arith.constant 0 : index
    %c0_62 = arith.constant 0 : index
    %c0_63 = arith.constant 0 : index
    %59 = vector.load %arg6[%c0_60, %c0_61, %c0_62, %c0_63] : memref<1x16x16x128xf32, #tpu.memory_space<vmem>>, vector<1x16x16x128xf32>
    tpu.vector_store %arg6[%c0_60, %c0_61, %c0_62, %c0_63], %58 {strides = array<i32>} : memref<1x16x16x128xf32, #tpu.memory_space<vmem>>, vector<1x16x16x128xf32>,
    return
  }
  func.func @transform_0(%arg0: i32, %arg1: i32, %arg2: i32) -> (i32, i32, i32, i32) {
    %c0_i32 = arith.constant 0 : i32
    %c0_i32_0 = arith.constant 0 : i32
    %c0_i32_1 = arith.constant 0 : i32
    %c0_i32_2 = arith.constant 0 : i32
    return %arg0, %c0_i32, %c0_i32_0, %c0_i32_1 : i32, i32, i32, i32
  }
  func.func @transform_1(%arg0: i32, %arg1: i32, %arg2: i32) -> (i32, i32) {
    %c0_i32 = arith.constant 0 : i32
    %c0_i32_0 = arith.constant 0 : i32
    return %c0_i32, %arg1 : i32, i32
  }
  func.func @transform_2(%arg0: i32, %arg1: i32, %arg2: i32) -> (i32, i32) {
    %c0_i32 = arith.constant 0 : i32
    %c0_i32_0 = arith.constant 0 : i32
    return %c0_i32, %arg1 : i32, i32
  }
  func.func @transform_3(%arg0: i32, %arg1: i32, %arg2: i32) -> (i32, i32, i32, i32) {
    %c0_i32 = arith.constant 0 : i32
    %c0_i32_0 = arith.constant 0 : i32
    return %arg0, %arg2, %c0_i32, %arg1 : i32, i32, i32, i32
  }
}

</mosaic_0001>

<bundles_post_ra>
// kernel: tpu_custom_call.1
= control target key start
LH: loop header
LB: loop body
LE: loop exit
PB: predicated region body
PF: predicated region fallthrough
CT: control target
= control target key end

     0   :  { %8 = vsyncpa [#allocation4], 0  ;;  %s4143_s0 = inlined_call_operand.vmem [shape: f32[2,18,18,4], index: 0, kind: input, shape index: {}]   ;;  %s4144_s1 = inlined_call_operand.vmem [shape: f32[128,128], index: 1, kind: input, shape index: {}]   ;;  %s4145_s2 = inlined_call_operand.vmem [shape: f32[1,128], index: 2, kind: input, shape index: {}]   ;;  %s4146_s3 = inlined_call_operand.hbm [shape: f32[2,16,16,128], index: 3, kind: output, shape index: {}]  }
   0x1   :  { %10 = vsyncpa [#allocation4 + $0x1], 0  ;;  %s2894_s12 = smov 0   ;;  %s2896_s13 = smov 0  }
   0x2   :  { %s2898_s14 = smov 0   ;;  %s2900_s15 = smov 0  }
   0x3   :  { %s2902_s16 = smov 0   ;;  %s2904_s17 = smov 0  }
   0x4 LB: > { %s2351_s18 = sadd.s32 4294967295, %s2861_s17   ;;  %s2352_s19 = sadd.s32 4294967294, %s2861_s17   ;;  %s2861_s17 = sphi %s2904_s17, %s16_s17   ;;  %s2857_s16 = sphi %s2902_s16, %s4172_s16   ;;  %s2853_s15 = sphi %s2900_s15, %s4171_s15   ;;  %s2849_s14 = sphi %s2898_s14, %s4170_s14   ;;  %s2845_s13 = sphi %s2896_s13, %s4169_s13   ;;  %s2841_s12 = sphi %s2894_s12, %s4168_s12  }
   0x5   : > { %s35_s20 = sadd.s32 1, %s2857_s16  ;;  %s124_s21 = sadd.s32 1, %s2849_s14 }
   0x6   : > { %p37_p0 = scmp.ge.s32.totalorder %s35_s20, 2  ;;  %p134_p1 = scmp.ne.s32.totalorder %s2849_s14, %s2845_s13 }
   0x7   : > { %p135_p2 = scmp.eq.s32.totalorder %s2351_s18, 1  ;;  %p140_p3 = scmp.ne.s32.totalorder %s2845_s13, %s2841_s12 }
   0x8   : > { %s4174_s20 = smov (%p37_p0, %s35_s20), 0  ;;  %p141_p5 = scmp.eq.s32.totalorder %s2352_s19, 1 }
   0x9   : > { %p2934_p4 = por %p135_p2, %p134_p1  ;;  %s117_s23 = ssub.s32 %s2857_s16, %s4174_s20 }
   0xa   : > { %p2357_p6 = scmp.ge.s32.totalorder %s2861_s17, 1  ;;  %p122_p7 = scmp.eq.s32.totalorder %s117_s23, 0 }
   0xb   : > { %p2941_p8 = por %p141_p5, %p140_p3  ;;  %p180_p9 = scmp.lt.s32.totalorder %s2861_s17, 3 }
   0xc   : > { %s2947_s25 = scalar_select %p122_p7, %s2849_s14, %s124_s21  }
   0xd   : > { %p181_p10 = pnand %p2357_p6, %p180_p9 }
   0xf   : > { %184 = sbr.rel (%p181_p10) target bundleno = 873 (0x369), region = 32 }
  0x14   : > { %p211_p11 = scmp.lt.s32.totalorder %s2853_s15, 1  ;;  %vm225_vm0 = vcmask 1047840   ;;  %v2863_v0 = vmov 0.0   ;;  %s2864_s4 = smov 4   ;;  %vm292_vm1 = vcmask 31744   ;;  %vm485_vm2 = vcmask 64544  }
  0x15   : > { %228 = vst.msk [vmem:[#allocation2 + $0x10] sm:$0xff] %vm225_vm0, %v2863_v0  ;;  %226 = vst.msk [vmem:[#allocation2] sm:$0xff] %vm225_vm0, %v2863_v0  ;;  %s2865_s5 = smov 8   ;;  %s2866_s6 = smov 12   ;;  %vm678_vm3 = vcmask 97344   ;;  %vm874_vm4 = vcmask 130144  }
  0x16   : > { %227 = vst.msk [vmem:[#allocation2 + $0x8] sm:$0xff] %vm225_vm0, %v2863_v0  ;;  %229 = vst.msk [vmem:[#allocation2 + $0x18] sm:$0xff] %vm225_vm0, %v2863_v0  ;;  %s212_s26 = scalar_select %p211_p11, %s2853_s15, 1  ;;  %vm1067_vm5 = vcmask 162944   ;;  %vm1260_vm6 = vcmask 195744   ;;  %vm1456_vm7 = vcmask 228544  }
  0x17   : > { %230 = vst.msk [vmem:[#allocation2 + $0x20] sm:$0xff] %vm225_vm0, %v2863_v0  ;;  %231 = vst.msk [vmem:[#allocation2 + $0x28] sm:$0xff] %vm225_vm0, %v2863_v0  ;;  %s2867_s7 = smov 16   ;;  %s2868_s10 = smov 20   ;;  %vm1649_vm8 = vcmask 261344   ;;  %vm1842_vm9 = vcmask 294144  }
  0x18   : > { %232 = vst.msk [vmem:[#allocation2 + $0x30] sm:$0xff] %vm225_vm0, %v2863_v0  ;;  %233 = vst.msk [vmem:[#allocation2 + $0x38] sm:$0xff] %vm225_vm0, %v2863_v0  ;;  %s2719_s27 = smul.u32 432, %s212_s26  ;;  %s2869_s29 = smov 24  }
  0x19   : > { %234 = vst.msk [vmem:[#allocation2 + $0x40] sm:$0xff] %vm225_vm0, %v2863_v0  ;;  %235 = vst.msk [vmem:[#allocation2 + $0x48] sm:$0xff] %vm225_vm0, %v2863_v0  ;;  %s2870_s19 = smov 28   ;;  %s2871_s9 = smov 32  }
  0x1a   : > { %236 = vst.msk [vmem:[#allocation2 + $0x50] sm:$0xff] %vm225_vm0, %v2863_v0  ;;  %237 = vst.msk [vmem:[#allocation2 + $0x58] sm:$0xff] %vm225_vm0, %v2863_v0  ;;  %s2988_s30 = scalar_lea.vmem %s4143_s0, %s2719_s27  ;;  %s2872_s23 = smov [#allocation3]  }
  0x1b   : > { %238 = vst.msk [vmem:[#allocation2 + $0x60] sm:$0xff] %vm225_vm0, %v2863_v0  ;;  %239 = vst.msk [vmem:[#allocation2 + $0x68] sm:$0xff] %vm225_vm0, %v2863_v0  ;;  %v2991_v1 = vld [vmem:[%s2988_s30 + $0x19] sm:$0xff]  ;;  %v325_v2 = vld [vmem:[%s2988_s30 + $0x1] sm:$0xff]  ;;  %s2789_s26 = sshll.u32 %s2872_s23, 4  ;;  %s2790_s26 = int_to_ptr.vmem [resolvable:$false] %s2789_s26 }
  0x1c   : > { %240 = vst.msk [vmem:[#allocation2 + $0x70] sm:$0xff] %vm225_vm0, %v2863_v0  ;;  %241 = vst.msk [vmem:[#allocation2 + $0x78] sm:$0xff] %vm225_vm0, %v2863_v0  ;;  %393 = vrot.lane.b32.xlu1 %v2991_v1, %s2864_s4  ;;  %389 = vrot.lane.b32.xlu0 %v325_v2, %s2864_s4  ;;  %v2998_v3 = vld [vmem:[%s2988_s30 + $0x21] sm:$0xff]  ;;  %v326_v4 = vld [vmem:[%s2988_s30 + $0x9] sm:$0xff]  ;;  %s2791_s27 = scalar_lea.vmem %s2790_s26, 8192 }
  0x1d   : > { %242 = vst.msk [vmem:[#allocation2 + $0x80] sm:$0xff] %vm225_vm0, %v2863_v0  ;;  %243 = vst.msk [vmem:[#allocation2 + $0x88] sm:$0xff] %vm225_vm0, %v2863_v0  ;;  %v3005_v5 = vld [vmem:[%s2988_s30 + $0x39] sm:$0xff]  ;;  %v3008_v6 = vld [vmem:[%s2988_s30 + $0x31] sm:$0xff] }
  0x1e   : > { %244 = vst.msk [vmem:[#allocation2 + $0x90] sm:$0xff] %vm225_vm0, %v2863_v0  ;;  %245 = vst.msk [vmem:[#allocation2 + $0x98] sm:$0xff] %vm225_vm0, %v2863_v0  ;;  %v3015_v7 = vld [vmem:[%s2988_s30 + $0x51] sm:$0xff]  ;;  %v3018_v8 = vld [vmem:[%s2988_s30 + $0x49] sm:$0xff] }
  0x1f   : > { %246 = vst.msk [vmem:[#allocation2 + $0xa0] sm:$0xff] %vm225_vm0, %v2863_v0  ;;  %247 = vst.msk [vmem:[#allocation2 + $0xa8] sm:$0xff] %vm225_vm0, %v2863_v0  ;;  %v3025_v9 = vld [vmem:[%s2988_s30 + $0x69] sm:$0xff]  ;;  %v3028_v10 = vld [vmem:[%s2988_s30 + $0x61] sm:$0xff] }
  0x20   : > { %248 = vst.msk [vmem:[#allocation2 + $0xb0] sm:$0xff] %vm225_vm0, %v2863_v0  ;;  %249 = vst.msk [vmem:[#allocation2 + $0xb8] sm:$0xff] %vm225_vm0, %v2863_v0  ;;  %395 = vrot.lane.b32.xlu1 %v2998_v3, %s2864_s4  ;;  %391 = vrot.lane.b32.xlu0 %v326_v4, %s2864_s4  ;;  %v3035_v11 = vld [vmem:[%s2988_s30 + $0x81] sm:$0xff]  ;;  %v3038_v12 = vld [vmem:[%s2988_s30 + $0x79] sm:$0xff] }
  0x21   : > { %250 = vst.msk [vmem:[#allocation2 + $0xc0] sm:$0xff] %vm225_vm0, %v2863_v0  ;;  %251 = vst.msk [vmem:[#allocation2 + $0xc8] sm:$0xff] %vm225_vm0, %v2863_v0  ;;  %v3045_v13 = vld [vmem:[%s2988_s30 + $0x18] sm:$0xff]  ;;  %v260_v14 = vld [vmem:[%s2988_s30] sm:$0xff] }
  0x22   : > { %252 = vst.msk [vmem:[#allocation2 + $0xd0] sm:$0xff] %vm225_vm0, %v2863_v0  ;;  %253 = vst.msk [vmem:[#allocation2 + $0xd8] sm:$0xff] %vm225_vm0, %v2863_v0  ;;  %v338_v15 = vld [vmem:[%s2988_s30 + $0x99] sm:$0xff]  ;;  %v3050_v16 = vld [vmem:[%s2988_s30 + $0x91] sm:$0xff] }
  0x23   : > { %254 = vst.msk [vmem:[#allocation2 + $0xe0] sm:$0xff] %vm225_vm0, %v2863_v0  ;;  %255 = vst.msk [vmem:[#allocation2 + $0xe8] sm:$0xff] %vm225_vm0, %v2863_v0  ;;  %v3056_v17 = vld [vmem:[%s2988_s30 + $0x20] sm:$0xff]  ;;  %v261_v18 = vld [vmem:[%s2988_s30 + $0x8] sm:$0xff] }
  0x24   : > { %256 = vst.msk [vmem:[#allocation2 + $0xf0] sm:$0xff] %vm225_vm0, %v2863_v0  ;;  %257 = vst.msk [vmem:[#allocation2 + $0xf8] sm:$0xff] %vm225_vm0, %v2863_v0  ;;  %399 = vrot.lane.b32.xlu1 %v3005_v5, %s2864_s4  ;;  %397 = vrot.lane.b32.xlu0 %v3008_v6, %s2864_s4  ;;  %v340_v19 = vld [vmem:[%s2988_s30 + $0xb1] sm:$0xff]  ;;  %v339_v22 = vld [vmem:[%s2988_s30 + $0xa9] sm:$0xff] }
  0x25   : > { %295 = vst.msk [vmem:[#allocation2 + $0x10] sm:$0xff] %vm292_vm1, %v3045_v13  ;;  %293 = vst.msk [vmem:[#allocation2] sm:$0xff] %vm292_vm1, %v260_v14  ;;  %v3064_v20 = vld [vmem:[%s2988_s30 + $0x38] sm:$0xff]  ;;  %v3067_v21 = vld [vmem:[%s2988_s30 + $0x30] sm:$0xff] }
  0x26   : > { %296 = vst.msk [vmem:[#allocation2 + $0x18] sm:$0xff] %vm292_vm1, %v3056_v17  ;;  %294 = vst.msk [vmem:[#allocation2 + $0x8] sm:$0xff] %vm292_vm1, %v261_v18  ;;  %v3078_v23 = vld [vmem:[%s2988_s30 + $0x50] sm:$0xff]  ;;  %v3083_v24 = vld [vmem:[%s2988_s30 + $0x48] sm:$0xff] }
  0x27   : > { %298 = vst.msk [vmem:[#allocation2 + $0x28] sm:$0xff] %vm292_vm1, %v3064_v20  ;;  %297 = vst.msk [vmem:[#allocation2 + $0x20] sm:$0xff] %vm292_vm1, %v3067_v21  ;;  %v3086_v25 = vld [vmem:[%s2988_s30 + $0x68] sm:$0xff]  ;;  %v3089_v26 = vld [vmem:[%s2988_s30 + $0x60] sm:$0xff] }
  0x28   : > { %403 = vrot.lane.b32.xlu1 %v3015_v7, %s2864_s4  ;;  %401 = vrot.lane.b32.xlu0 %v3018_v8, %s2864_s4  ;;  %300 = vst.msk [vmem:[#allocation2 + $0x38] sm:$0xff] %vm292_vm1, %v3078_v23  ;;  %299 = vst.msk [vmem:[#allocation2 + $0x30] sm:$0xff] %vm292_vm1, %v3083_v24  ;;  %v3098_v27 = vld [vmem:[%s2988_s30 + $0x80] sm:$0xff]  ;;  %v3101_v28 = vld [vmem:[%s2988_s30 + $0x78] sm:$0xff] }
  0x29   : > { %302 = vst.msk [vmem:[#allocation2 + $0x48] sm:$0xff] %vm292_vm1, %v3086_v25  ;;  %301 = vst.msk [vmem:[#allocation2 + $0x40] sm:$0xff] %vm292_vm1, %v3089_v26  ;;  %v3104_v29 = vld [vmem:[%s2988_s30 + $0x98] sm:$0xff]  ;;  %v342_v30 = vld [vmem:[%s2988_s30 + $0xc9] sm:$0xff] }
  0x2a   : > { %v341_v31 = vld [vmem:[%s2988_s30 + $0xc1] sm:$0xff]  ;;  %304 = vst.msk [vmem:[#allocation2 + $0x58] sm:$0xff] %vm292_vm1, %v3098_v27  ;;  %303 = vst.msk [vmem:[#allocation2 + $0x50] sm:$0xff] %vm292_vm1, %v3101_v28  ;;  %v3115_v32 = vld [vmem:[%s2988_s30 + $0x90] sm:$0xff] }
  0x2b   : > { %306 = vst.msk [vmem:[#allocation2 + $0x68] sm:$0xff] %vm292_vm1, %v3104_v29  ;;  %v3118_v33 = vld [vmem:[%s2988_s30 + $0xb0] sm:$0xff]  ;;  %v3121_v34 = vld [vmem:[%s2988_s30 + $0xa8] sm:$0xff]  ;;  %305 = vst.msk [vmem:[#allocation2 + $0x60] sm:$0xff] %vm292_vm1, %v3115_v32 }
  0x2c   : > { %407 = vrot.lane.b32.xlu1 %v3025_v9, %s2864_s4  ;;  %405 = vrot.lane.b32.xlu0 %v3028_v10, %s2864_s4  ;;  %308 = vst.msk [vmem:[#allocation2 + $0x78] sm:$0xff] %vm292_vm1, %v3118_v33  ;;  %307 = vst.msk [vmem:[#allocation2 + $0x70] sm:$0xff] %vm292_vm1, %v3121_v34  ;;  %v3132_v35 = vld [vmem:[%s2988_s30 + $0xc8] sm:$0xff]  ;;  %v3135_v36 = vld [vmem:[%s2988_s30 + $0xc0] sm:$0xff] }
  0x2d   : > { %310 = vst.msk [vmem:[#allocation2 + $0x88] sm:$0xff] %vm292_vm1, %v3132_v35  ;;  %309 = vst.msk [vmem:[#allocation2 + $0x80] sm:$0xff] %vm292_vm1, %v3135_v36  ;;  %v3142_v37 = vld [vmem:[%s2988_s30 + $0xe0] sm:$0xff]  ;;  %v3145_v38 = vld [vmem:[%s2988_s30 + $0xd8] sm:$0xff] }
  0x2e   : > { %v3148_v39 = vld [vmem:[%s2988_s30 + $0xf8] sm:$0xff]  ;;  %312 = vst.msk [vmem:[#allocation2 + $0x98] sm:$0xff] %vm292_vm1, %v3142_v37  ;;  %311 = vst.msk [vmem:[#allocation2 + $0x90] sm:$0xff] %vm292_vm1, %v3145_v38  ;;  %v3157_v40 = vld [vmem:[%s2988_s30 + $0xf0] sm:$0xff] }
  0x2f   : > { %314 = vst.msk [vmem:[#allocation2 + $0xa8] sm:$0xff] %vm292_vm1, %v3148_v39  ;;  %v3160_v41 = vld [vmem:[%s2988_s30 + $0x110] sm:$0xff]  ;;  %v3163_v42 = vld [vmem:[%s2988_s30 + $0x108] sm:$0xff]  ;;  %313 = vst.msk [vmem:[#allocation2 + $0xa0] sm:$0xff] %vm292_vm1, %v3157_v40 }
  0x30   : > { %411 = vrot.lane.b32.xlu1 %v3035_v11, %s2864_s4  ;;  %409 = vrot.lane.b32.xlu0 %v3038_v12, %s2864_s4  ;;  %316 = vst.msk [vmem:[#allocation2 + $0xb8] sm:$0xff] %vm292_vm1, %v3160_v41  ;;  %315 = vst.msk [vmem:[#allocation2 + $0xb0] sm:$0xff] %vm292_vm1, %v3163_v42  ;;  %v3174_v43 = vld [vmem:[%s2988_s30 + $0xe1] sm:$0xff]  ;;  %v3177_v44 = vld [vmem:[%s2988_s30 + $0xd9] sm:$0xff] }
  0x31   : > { %v3180_v45 = vld [vmem:[%s2988_s30 + $0x128] sm:$0xff]  ;;  %v3183_v46 = vld [vmem:[%s2988_s30 + $0x120] sm:$0xff]  ;;  %v3197_v48 = vld [vmem:[%s2988_s30 + $0xf1] sm:$0xff] }
  0x32   : > { %318 = vst.msk [vmem:[#allocation2 + $0xc8] sm:$0xff] %vm292_vm1, %v3180_v45  ;;  %317 = vst.msk [vmem:[#allocation2 + $0xc0] sm:$0xff] %vm292_vm1, %v3183_v46  ;;  %v3194_v47 = vld [vmem:[%s2988_s30 + $0xf9] sm:$0xff]  ;;  %v3214_v51 = vld [vmem:[%s2988_s30 + $0x111] sm:$0xff] }
  0x33   : > { %v3200_v49 = vld [vmem:[%s2988_s30 + $0x140] sm:$0xff]  ;;  %v3203_v50 = vld [vmem:[%s2988_s30 + $0x138] sm:$0xff]  ;;  %4158 = vst [vmem:[#allocation6_spill] sm:$0xff] %v3214_v51  ;;  %v3217_v52 = vld [vmem:[%s2988_s30 + $0x109] sm:$0xff] }
  0x34   : > { %415 = vrot.lane.b32.xlu1 %v338_v15, %s2864_s4  ;;  %413 = vrot.lane.b32.xlu0 %v3050_v16, %s2864_s4  ;;  %320 = vst.msk [vmem:[#allocation2 + $0xd8] sm:$0xff] %vm292_vm1, %v3200_v49  ;;  %319 = vst.msk [vmem:[#allocation2 + $0xd0] sm:$0xff] %vm292_vm1, %v3203_v50  ;;  %v3220_v53 = vld [vmem:[%s2988_s30 + $0x158] sm:$0xff]  ;;  %v3223_v54 = vld [vmem:[%s2988_s30 + $0x150] sm:$0xff] }
  0x35   : > { %322 = vst.msk [vmem:[#allocation2 + $0xe8] sm:$0xff] %vm292_vm1, %v3220_v53  ;;  %321 = vst.msk [vmem:[#allocation2 + $0xe0] sm:$0xff] %vm292_vm1, %v3223_v54  ;;  %v350_v55 = vld [vmem:[%s2988_s30 + $0x129] sm:$0xff]  ;;  %v349_v56 = vld [vmem:[%s2988_s30 + $0x121] sm:$0xff] }
  0x36   : > { %v3236_v57 = vld [vmem:[%s2988_s30 + $0x170] sm:$0xff]  ;;  %v3239_v58 = vld [vmem:[%s2988_s30 + $0x168] sm:$0xff]  ;;  %v351_v60 = vld [vmem:[%s2988_s30 + $0x139] sm:$0xff] }
  0x37   : > { %324 = vst.msk [vmem:[#allocation2 + $0xf8] sm:$0xff] %vm292_vm1, %v3236_v57  ;;  %323 = vst.msk [vmem:[#allocation2 + $0xf0] sm:$0xff] %vm292_vm1, %v3239_v58  ;;  %v352_v59 = vld [vmem:[%s2988_s30 + $0x141] sm:$0xff]  ;;  %v354_v61 = vld [vmem:[%s2988_s30 + $0x159] sm:$0xff] }
  0x38   : > { %419 = vrot.lane.b32.xlu1 %v340_v19, %s2864_s4  ;;  %417 = vrot.lane.b32.xlu0 %v339_v22, %s2864_s4  ;;  %v353_v62 = vld [vmem:[%s2988_s30 + $0x151] sm:$0xff]  ;;  %v355_v0 = vld [vmem:[%s2988_s30 + $0x169] sm:$0xff] }
  0x39   : > { %v356_v63 = vld [vmem:[%s2988_s30 + $0x171] sm:$0xff]  ;;  %v518_v4 = vld [vmem:[%s2988_s30 + $0x2] sm:$0xff]  ;;  %v3267_v15 = vld [vmem:[%s2988_s30 + $0x1a] sm:$0xff] }
  0x3a   : > { %v519_v2 = vld [vmem:[%s2988_s30 + $0xa] sm:$0xff]  ;;  %v3264_v14 = vld [vmem:[%s2988_s30 + $0x22] sm:$0xff]  ;;  %v3274_v18 = vld [vmem:[%s2988_s30 + $0x3a] sm:$0xff] }
  0x3b   : > { %v3277_v19 = vld [vmem:[%s2988_s30 + $0x32] sm:$0xff] }
  0x3c   : > { %423 = vrot.lane.b32.xlu1 %v342_v30, %s2864_s4  ;;  %421 = vrot.lane.b32.xlu0 %v341_v31, %s2864_s4  ;;  %v3284_v22 = vld [vmem:[%s2988_s30 + $0x52] sm:$0xff]  ;;  %v3287_v30 = vld [vmem:[%s2988_s30 + $0x4a] sm:$0xff] }
  0x3d   : > { %4159 = vst [vmem:[#allocation7_spill] sm:$0xff] %v3284_v22  ;;  %4160 = vst [vmem:[#allocation8_spill] sm:$0xff] %v3287_v30  ;;  %v527_v31 = vld [vmem:[%s2988_s30 + $0x6a] sm:$0xff] }
  0x40   : > { %427 = vrot.lane.b32.xlu1 %v3174_v43, %s2864_s4  ;;  %425 = vrot.lane.b32.xlu0 %v3177_v44, %s2864_s4 }
  0x44   : > { %431 = vrot.lane.b32.xlu1 %v3194_v47, %s2864_s4  ;;  %429 = vrot.lane.b32.xlu0 %v3197_v48, %s2864_s4 }
  0x48   : > { %435 = vrot.lane.b32.xlu1 %v3214_v51, %s2864_s4  ;;  %433 = vrot.lane.b32.xlu0 %v3217_v52, %s2864_s4 }
  0x4c   : > { %439 = vrot.lane.b32.xlu1 %v350_v55, %s2864_s4  ;;  %437 = vrot.lane.b32.xlu0 %v349_v56, %s2864_s4  ;;  %v526_v55 = vld [vmem:[%s2988_s30 + $0x62] sm:$0xff] }
  0x4d   : > { %v529_v56 = vld [vmem:[%s2988_s30 + $0x82] sm:$0xff] }
  0x50   : > { %443 = vrot.lane.b32.xlu1 %v352_v59, %s2864_s4  ;;  %441 = vrot.lane.b32.xlu0 %v351_v60, %s2864_s4  ;;  %v528_v59 = vld [vmem:[%s2988_s30 + $0x7a] sm:$0xff] }
  0x51   : > { %v531_v60 = vld [vmem:[%s2988_s30 + $0x9a] sm:$0xff] }
  0x54   : > { %447 = vrot.lane.b32.xlu1 %v354_v61, %s2864_s4  ;;  %445 = vrot.lane.b32.xlu0 %v353_v62, %s2864_s4  ;;  %v530_v61 = vld [vmem:[%s2988_s30 + $0x92] sm:$0xff] }
  0x55   : > { %v533_v62 = vld [vmem:[%s2988_s30 + $0xb2] sm:$0xff] }
  0x58   : > { %451 = vrot.lane.b32.xlu1 %v356_v63, %s2864_s4  ;;  %449 = vrot.lane.b32.xlu0 %v355_v0, %s2864_s4  ;;  %v532_v63 = vld [vmem:[%s2988_s30 + $0xaa] sm:$0xff] }
  0x59   : > { %v535_v0 = vld [vmem:[%s2988_s30 + $0xca] sm:$0xff] }
  0x5c   : > { %584 = vrot.lane.b32.xlu1 %v519_v2, %s2865_s5  ;;  %582 = vrot.lane.b32.xlu0 %v518_v4, %s2865_s5  ;;  %v534_v2 = vld [vmem:[%s2988_s30 + $0xc2] sm:$0xff] }
  0x5d   : > { %v3314_v4 = vld [vmem:[%s2988_s30 + $0xe2] sm:$0xff] }
  0x60   : > { %588 = vrot.lane.b32.xlu1 %v3264_v14, %s2865_s5  ;;  %586 = vrot.lane.b32.xlu0 %v3267_v15, %s2865_s5 }
  0x64   : > { %592 = vrot.lane.b32.xlu1 %v3274_v18, %s2865_s5  ;;  %590 = vrot.lane.b32.xlu0 %v3277_v19, %s2865_s5 }
  0x68   : > { %596 = vrot.lane.b32.xlu1 %v3284_v22, %s2865_s5  ;;  %594 = vrot.lane.b32.xlu0 %v3287_v30, %s2865_s5  ;;  %v546_v30 = vld [vmem:[%s2988_s30 + $0x152] sm:$0xff] }
  0x6c   : > { %600 = vrot.lane.b32.xlu1 %v527_v31, %s2865_s5  ;;  %598 = vrot.lane.b32.xlu0 %v526_v55, %s2865_s5  ;;  %v3317_v31 = vld [vmem:[%s2988_s30 + $0xda] sm:$0xff] }
  0x6d   : > { %v3324_v55 = vld [vmem:[%s2988_s30 + $0xfa] sm:$0xff] }
  0x70   : > { %604 = vrot.lane.b32.xlu1 %v529_v56, %s2865_s5  ;;  %602 = vrot.lane.b32.xlu0 %v528_v59, %s2865_s5  ;;  %v3327_v56 = vld [vmem:[%s2988_s30 + $0xf2] sm:$0xff] }
  0x71   : > { %v3334_v59 = vld [vmem:[%s2988_s30 + $0x112] sm:$0xff] }
  0x72   : > { %4161 = vst [vmem:[#allocation9_spill] sm:$0xff] %v3334_v59 }
  0x74   : > { %608 = vrot.lane.b32.xlu1 %v531_v60, %s2865_s5  ;;  %606 = vrot.lane.b32.xlu0 %v530_v61, %s2865_s5  ;;  %v3337_v60 = vld [vmem:[%s2988_s30 + $0x10a] sm:$0xff] }
  0x75   : > { %4162 = vst [vmem:[#allocation10_spill] sm:$0xff] %v3337_v60  ;;  %v543_v61 = vld [vmem:[%s2988_s30 + $0x12a] sm:$0xff] }
  0x78   : > { %612 = vrot.lane.b32.xlu1 %v533_v62, %s2865_s5  ;;  %610 = vrot.lane.b32.xlu0 %v532_v63, %s2865_s5  ;;  %v542_v62 = vld [vmem:[%s2988_s30 + $0x122] sm:$0xff] }
  0x79   : > { %v545_v63 = vld [vmem:[%s2988_s30 + $0x142] sm:$0xff] }
  0x7c   : > { %616 = vrot.lane.b32.xlu1 %v535_v0, %s2865_s5  ;;  %614 = vrot.lane.b32.xlu0 %v534_v2, %s2865_s5  ;;  %v544_v0 = vld [vmem:[%s2988_s30 + $0x13a] sm:$0xff] }
  0x80   : > { %620 = vrot.lane.b32.xlu1 %v3314_v4, %s2865_s5  ;;  %618 = vrot.lane.b32.xlu0 %v3317_v31, %s2865_s5 }
  0x84   : > { %624 = vrot.lane.b32.xlu1 %v3324_v55, %s2865_s5  ;;  %622 = vrot.lane.b32.xlu0 %v3327_v56, %s2865_s5 }
  0x88   : > { %628 = vrot.lane.b32.xlu1 %v3334_v59, %s2865_s5  ;;  %626 = vrot.lane.b32.xlu0 %v3337_v60, %s2865_s5  ;;  %v547_v59 = vld [vmem:[%s2988_s30 + $0x15a] sm:$0xff] }
  0x8c   : > { %632 = vrot.lane.b32.xlu1 %v543_v61, %s2865_s5  ;;  %630 = vrot.lane.b32.xlu0 %v542_v62, %s2865_s5  ;;  %v549_v62 = vld [vmem:[%s2988_s30 + $0x172] sm:$0xff] }
  0x8e   : > { %v394_v2 = vpop.permute.xlu1 %393  ;;  %v390_v22 = vpop.permute.xlu0 %389 }
  0x8f   : > { %488 = vst.msk [vmem:[#allocation2 + $0x10] sm:$0xff] %vm485_vm2, %v394_v2  ;;  %486 = vst.msk [vmem:[#allocation2] sm:$0xff] %vm485_vm2, %v390_v22  ;;  %v548_v2 = vld [vmem:[%s2988_s30 + $0x16a] sm:$0xff] }
  0x90   : > { %636 = vrot.lane.b32.xlu1 %v545_v63, %s2865_s5  ;;  %634 = vrot.lane.b32.xlu0 %v544_v0, %s2865_s5 }
  0x92   : > { %v396_v61 = vpop.permute.xlu1 %395  ;;  %v392_v60 = vpop.permute.xlu0 %391 }
  0x93   : > { %489 = vst.msk [vmem:[#allocation2 + $0x18] sm:$0xff] %vm485_vm2, %v396_v61  ;;  %487 = vst.msk [vmem:[#allocation2 + $0x8] sm:$0xff] %vm485_vm2, %v392_v60 }
  0x94   : > { %640 = vrot.lane.b32.xlu1 %v547_v59, %s2865_s5  ;;  %638 = vrot.lane.b32.xlu0 %v546_v30, %s2865_s5 }
  0x96   : > { %v400_v51 = vpop.permute.xlu1 %399  ;;  %v398_v22 = vpop.permute.xlu0 %397 }
  0x97   : > { %491 = vst.msk [vmem:[#allocation2 + $0x28] sm:$0xff] %vm485_vm2, %v400_v51  ;;  %490 = vst.msk [vmem:[#allocation2 + $0x20] sm:$0xff] %vm485_vm2, %v398_v22 }
  0x98   : > { %644 = vrot.lane.b32.xlu1 %v549_v62, %s2865_s5  ;;  %642 = vrot.lane.b32.xlu0 %v548_v2, %s2865_s5 }
  0x9a   : > { %v404_v63 = vpop.permute.xlu1 %403  ;;  %v402_v0 = vpop.permute.xlu0 %401 }
  0x9b   : > { %493 = vst.msk [vmem:[#allocation2 + $0x38] sm:$0xff] %vm485_vm2, %v404_v63  ;;  %492 = vst.msk [vmem:[#allocation2 + $0x30] sm:$0xff] %vm485_vm2, %v402_v0 }
  0x9c   : > { %780 = vrot.lane.b32.xlu1 %v3056_v17, %s2866_s6  ;;  %778 = vrot.lane.b32.xlu0 %v3045_v13, %s2866_s6 }
  0x9e   : > { %v408_v51 = vpop.permute.xlu1 %407  ;;  %v406_v30 = vpop.permute.xlu0 %405 }
  0x9f   : > { %495 = vst.msk [vmem:[#allocation2 + $0x48] sm:$0xff] %vm485_vm2, %v408_v51  ;;  %494 = vst.msk [vmem:[#allocation2 + $0x40] sm:$0xff] %vm485_vm2, %v406_v30 }
  0xa0   : > { %784 = vrot.lane.b32.xlu1 %v3064_v20, %s2866_s6  ;;  %782 = vrot.lane.b32.xlu0 %v3067_v21, %s2866_s6 }
  0xa2   : > { %v412_v59 = vpop.permute.xlu1 %411  ;;  %v410_v60 = vpop.permute.xlu0 %409 }
  0xa3   : > { %497 = vst.msk [vmem:[#allocation2 + $0x58] sm:$0xff] %vm485_vm2, %v412_v59  ;;  %496 = vst.msk [vmem:[#allocation2 + $0x50] sm:$0xff] %vm485_vm2, %v410_v60 }
  0xa4   : > { %788 = vrot.lane.b32.xlu1 %v3078_v23, %s2866_s6  ;;  %786 = vrot.lane.b32.xlu0 %v3083_v24, %s2866_s6 }
  0xa6   : > { %v416_v13 = vpop.permute.xlu1 %415  ;;  %v414_v17 = vpop.permute.xlu0 %413 }
  0xa7   : > { %499 = vst.msk [vmem:[#allocation2 + $0x68] sm:$0xff] %vm485_vm2, %v416_v13  ;;  %498 = vst.msk [vmem:[#allocation2 + $0x60] sm:$0xff] %vm485_vm2, %v414_v17 }
  0xa8   : > { %792 = vrot.lane.b32.xlu1 %v3086_v25, %s2866_s6  ;;  %790 = vrot.lane.b32.xlu0 %v3089_v26, %s2866_s6 }
  0xaa   : > { %v420_v61 = vpop.permute.xlu1 %419  ;;  %v418_v62 = vpop.permute.xlu0 %417 }
  0xab   : > { %501 = vst.msk [vmem:[#allocation2 + $0x78] sm:$0xff] %vm485_vm2, %v420_v61  ;;  %500 = vst.msk [vmem:[#allocation2 + $0x70] sm:$0xff] %vm485_vm2, %v418_v62 }
  0xac   : > { %796 = vrot.lane.b32.xlu1 %v3098_v27, %s2866_s6  ;;  %794 = vrot.lane.b32.xlu0 %v3101_v28, %s2866_s6 }
  0xae   : > { %v424_v2 = vpop.permute.xlu1 %423  ;;  %v422_v22 = vpop.permute.xlu0 %421 }
  0xaf   : > { %503 = vst.msk [vmem:[#allocation2 + $0x88] sm:$0xff] %vm485_vm2, %v424_v2  ;;  %502 = vst.msk [vmem:[#allocation2 + $0x80] sm:$0xff] %vm485_vm2, %v422_v22  ;;  %v2391_v2 = vld [vmem:[%s2988_s30 + $0x188] sm:$0xff]  ;;  %v2390_v22 = vld [vmem:[%s2988_s30 + $0x180] sm:$0xff] }
  0xb0   : > { %800 = vrot.lane.b32.xlu1 %v3104_v29, %s2866_s6  ;;  %798 = vrot.lane.b32.xlu0 %v3115_v32, %s2866_s6 }
  0xb2   : > { %v428_v63 = vpop.permute.xlu1 %427  ;;  %v426_v0 = vpop.permute.xlu0 %425 }
  0xb3   : > { %505 = vst.msk [vmem:[#allocation2 + $0x98] sm:$0xff] %vm485_vm2, %v428_v63  ;;  %504 = vst.msk [vmem:[#allocation2 + $0x90] sm:$0xff] %vm485_vm2, %v426_v0 }
  0xb4   : > { %804 = vrot.lane.b32.xlu1 %v3118_v33, %s2866_s6  ;;  %802 = vrot.lane.b32.xlu0 %v3121_v34, %s2866_s6 }
  0xb6   : > { %v432_v51 = vpop.permute.xlu1 %431  ;;  %v430_v30 = vpop.permute.xlu0 %429 }
  0xb7   : > { %507 = vst.msk [vmem:[#allocation2 + $0xa8] sm:$0xff] %vm485_vm2, %v432_v51  ;;  %506 = vst.msk [vmem:[#allocation2 + $0xa0] sm:$0xff] %vm485_vm2, %v430_v30 }
  0xb8   : > { %808 = vrot.lane.b32.xlu1 %v3132_v35, %s2866_s6  ;;  %806 = vrot.lane.b32.xlu0 %v3135_v36, %s2866_s6 }
  0xba   : > { %v436_v29 = vpop.permute.xlu1 %435  ;;  %v434_v32 = vpop.permute.xlu0 %433 }
  0xbb   : > { %509 = vst.msk [vmem:[#allocation2 + $0xb8] sm:$0xff] %vm485_vm2, %v436_v29  ;;  %508 = vst.msk [vmem:[#allocation2 + $0xb0] sm:$0xff] %vm485_vm2, %v434_v32 }
  0xbc   : > { %812 = vrot.lane.b32.xlu1 %v3142_v37, %s2866_s6  ;;  %810 = vrot.lane.b32.xlu0 %v3145_v38, %s2866_s6 }
  0xbe   : > { %v440_v33 = vpop.permute.xlu1 %439  ;;  %v438_v34 = vpop.permute.xlu0 %437 }
  0xbf   : > { %511 = vst.msk [vmem:[#allocation2 + $0xc8] sm:$0xff] %vm485_vm2, %v440_v33  ;;  %510 = vst.msk [vmem:[#allocation2 + $0xc0] sm:$0xff] %vm485_vm2, %v438_v34  ;;  %v1920_v34 = vld [vmem:[%s4144_s1 + $0x68] sm:$0xff] }
  0xc0   : > { %816 = vrot.lane.b32.xlu1 %v3148_v39, %s2866_s6  ;;  %814 = vrot.lane.b32.xlu0 %v3157_v40, %s2866_s6 }
  0xc2   : > { %v444_v35 = vpop.permute.xlu1 %443  ;;  %v442_v36 = vpop.permute.xlu0 %441 }
  0xc3   : > { %513 = vst.msk [vmem:[#allocation2 + $0xd8] sm:$0xff] %vm485_vm2, %v444_v35  ;;  %512 = vst.msk [vmem:[#allocation2 + $0xd0] sm:$0xff] %vm485_vm2, %v442_v36 }
  0xc4   : > { %820 = vrot.lane.b32.xlu1 %v3160_v41, %s2866_s6  ;;  %818 = vrot.lane.b32.xlu0 %v3163_v42, %s2866_s6 }
  0xc6   : > { %v448_v37 = vpop.permute.xlu1 %447  ;;  %v446_v38 = vpop.permute.xlu0 %445 }
  0xc7   : > { %515 = vst.msk [vmem:[#allocation2 + $0xe8] sm:$0xff] %vm485_vm2, %v448_v37  ;;  %514 = vst.msk [vmem:[#allocation2 + $0xe0] sm:$0xff] %vm485_vm2, %v446_v38  ;;  %v1917_v37 = vld [vmem:[%s4144_s1 + $0x50] sm:$0xff] }
  0xc8   : > { %824 = vrot.lane.b32.xlu1 %v3180_v45, %s2866_s6  ;;  %822 = vrot.lane.b32.xlu0 %v3183_v46, %s2866_s6 }
  0xca   : > { %v452_v59 = vpop.permute.xlu1 %451  ;;  %v450_v60 = vpop.permute.xlu0 %449 }
  0xcb   : > { %517 = vst.msk [vmem:[#allocation2 + $0xf8] sm:$0xff] %vm485_vm2, %v452_v59  ;;  %516 = vst.msk [vmem:[#allocation2 + $0xf0] sm:$0xff] %vm485_vm2, %v450_v60  ;;  %v1914_v60 = vld [vmem:[%s4144_s1 + $0x38] sm:$0xff] }
  0xcc   : > { %828 = vrot.lane.b32.xlu1 %v3200_v49, %s2866_s6  ;;  %826 = vrot.lane.b32.xlu0 %v3203_v50, %s2866_s6 }
  0xce   : > { %v585_v13 = vpop.permute.xlu1 %584  ;;  %v583_v17 = vpop.permute.xlu0 %582 }
  0xcf   : > { %680 = vst.msk [vmem:[#allocation2 + $0x8] sm:$0xff] %vm678_vm3, %v585_v13  ;;  %679 = vst.msk [vmem:[#allocation2] sm:$0xff] %vm678_vm3, %v583_v17  ;;  %v1912_v17 = vld [vmem:[%s4144_s1 + $0x28] sm:$0xff] }
  0xd0   : > { %832 = vrot.lane.b32.xlu1 %v3220_v53, %s2866_s6  ;;  %830 = vrot.lane.b32.xlu0 %v3223_v54, %s2866_s6 }
  0xd2   : > { %v589_v61 = vpop.permute.xlu1 %588  ;;  %v587_v62 = vpop.permute.xlu0 %586 }
  0xd3   : > { %682 = vst.msk [vmem:[#allocation2 + $0x18] sm:$0xff] %vm678_vm3, %v589_v61  ;;  %681 = vst.msk [vmem:[#allocation2 + $0x10] sm:$0xff] %vm678_vm3, %v587_v62  ;;  %v1911_v62 = vld [vmem:[%s4144_s1 + $0x20] sm:$0xff] }
  0xd4   : > { %836 = vrot.lane.b32.xlu1 %v3236_v57, %s2866_s6  ;;  %834 = vrot.lane.b32.xlu0 %v3239_v58, %s2866_s6 }
  0xd6   : > { %v593_v63 = vpop.permute.xlu1 %592  ;;  %v591_v0 = vpop.permute.xlu0 %590 }
  0xd7   : > { %684 = vst.msk [vmem:[#allocation2 + $0x28] sm:$0xff] %vm678_vm3, %v593_v63  ;;  %683 = vst.msk [vmem:[#allocation2 + $0x20] sm:$0xff] %vm678_vm3, %v591_v0  ;;  %v1909_v63 = vld [vmem:[%s4144_s1 + $0x10] sm:$0xff] }
  0xd8   : > { %840 = vrot.lane.b32.xlu1 %v2391_v2, %s2866_s6  ;;  %838 = vrot.lane.b32.xlu0 %v2390_v22, %s2866_s6  ;;  %s2558_s6 = sshll.u32 %s2853_s15, 12 }
  0xd9   : > { %s4087_s18 = scalar_lea.hbm %s4146_s3, %s2558_s6 }
  0xda   : > { %v597_v53 = vpop.permute.xlu1 %596  ;;  %v595_v51 = vpop.permute.xlu0 %594 }
  0xdb   : > { %686 = vst.msk [vmem:[#allocation2 + $0x38] sm:$0xff] %vm678_vm3, %v597_v53  ;;  %685 = vst.msk [vmem:[#allocation2 + $0x30] sm:$0xff] %vm678_vm3, %v595_v51  ;;  %v1908_v51 = vld [vmem:[%s4144_s1 + $0x8] sm:$0xff] }
  0xdc   : > { %973 = vrot.lane.b32.xlu1 %v2998_v3, %s2867_s7  ;;  %971 = vrot.lane.b32.xlu0 %v2991_v1, %s2867_s7 }
  0xde   : > { %v601_v57 = vpop.permute.xlu1 %600  ;;  %v599_v58 = vpop.permute.xlu0 %598 }
  0xdf   : > { %688 = vst.msk [vmem:[#allocation2 + $0x48] sm:$0xff] %vm678_vm3, %v601_v57  ;;  %687 = vst.msk [vmem:[#allocation2 + $0x40] sm:$0xff] %vm678_vm3, %v599_v58 }
  0xe0   : > { %977 = vrot.lane.b32.xlu1 %v3005_v5, %s2867_s7  ;;  %975 = vrot.lane.b32.xlu0 %v3008_v6, %s2867_s7 }
  0xe2   : > { %v605_v30 = vpop.permute.xlu1 %604  ;;  %v603_v29 = vpop.permute.xlu0 %602 }
  0xe3   : > { %690 = vst.msk [vmem:[#allocation2 + $0x58] sm:$0xff] %vm678_vm3, %v605_v30  ;;  %689 = vst.msk [vmem:[#allocation2 + $0x50] sm:$0xff] %vm678_vm3, %v603_v29  ;;  %v2490_v29 = vld [vmem:[%s2988_s30 + $0x49] sm:$0xff] }
  0xe4   : > { %981 = vrot.lane.b32.xlu1 %v3015_v7, %s2867_s7  ;;  %979 = vrot.lane.b32.xlu0 %v3018_v8, %s2867_s7 }
  0xe6   : > { %v609_v1 = vpop.permute.xlu1 %608  ;;  %v607_v3 = vpop.permute.xlu0 %606 }
  0xe7   : > { %692 = vst.msk [vmem:[#allocation2 + $0x68] sm:$0xff] %vm678_vm3, %v609_v1  ;;  %691 = vst.msk [vmem:[#allocation2 + $0x60] sm:$0xff] %vm678_vm3, %v607_v3 }
  0xe8   : > { %985 = vrot.lane.b32.xlu1 %v3025_v9, %s2867_s7  ;;  %983 = vrot.lane.b32.xlu0 %v3028_v10, %s2867_s7 }
  0xea   : > { %v613_v32 = vpop.permute.xlu1 %612  ;;  %v611_v33 = vpop.permute.xlu0 %610 }
  0xeb   : > { %694 = vst.msk [vmem:[#allocation2 + $0x78] sm:$0xff] %vm678_vm3, %v613_v32  ;;  %693 = vst.msk [vmem:[#allocation2 + $0x70] sm:$0xff] %vm678_vm3, %v611_v33 }
  0xec   : > { %989 = vrot.lane.b32.xlu1 %v3035_v11, %s2867_s7  ;;  %987 = vrot.lane.b32.xlu0 %v3038_v12, %s2867_s7  ;;  %v1922_v11 = vld [vmem:[%s4144_s1 + $0x78] sm:$0xff]  ;;  %v1921_v12 = vld [vmem:[%s4144_s1 + $0x70] sm:$0xff] }
  0xed   : > { %2607 = vmatprep.subr.mxu0 %v1922_v11  ;;  %2687 = vmatprep.subr.mxu1 %v1922_v11 }
  0xee   : > { %v617_v7 = vpop.permute.xlu1 %616  ;;  %v615_v8 = vpop.permute.xlu0 %614  ;;  %2608 = vmatpush3.msra.mxu0 %v1922_v11  ;;  %2703 = vmatpush3.msra.mxu1 %v1922_v11 }
  0xef   : > { %696 = vst.msk [vmem:[#allocation2 + $0x88] sm:$0xff] %vm678_vm3, %v617_v7  ;;  %695 = vst.msk [vmem:[#allocation2 + $0x80] sm:$0xff] %vm678_vm3, %v615_v8  ;;  %2609 = vmatprep.subr.mxu0 %v1921_v12  ;;  %2688 = vmatprep.subr.mxu1 %v1921_v12  ;;  %v4165_v8 = vld [vmem:[#allocation8_spill] sm:$0xff] }
  0xf0   : > { %1003 = vrot.lane.b32.xlu1 %v3177_v44, %s2867_s7  ;;  %991 = vrot.lane.b32.xlu0 %v3050_v16, %s2867_s7 }
  0xf1   : > { %2610 = vmatpush3.msra.mxu0 %v1921_v12  ;;  %2704 = vmatpush3.msra.mxu1 %v1921_v12 }
  0xf2   : > { %v621_v9 = vpop.permute.xlu1 %620  ;;  %v619_v10 = vpop.permute.xlu0 %618  ;;  %2611 = vmatprep.subr.mxu0 %v1920_v34  ;;  %2689 = vmatprep.subr.mxu1 %v1920_v34 }
  0xf3   : > { %698 = vst.msk [vmem:[#allocation2 + $0x98] sm:$0xff] %vm678_vm3, %v621_v9  ;;  %697 = vst.msk [vmem:[#allocation2 + $0x90] sm:$0xff] %vm678_vm3, %v619_v10  ;;  %2612 = vmatpush3.msra.mxu0 %v1920_v34  ;;  %2705 = vmatpush3.msra.mxu1 %v1920_v34  ;;  %v2413_v9 = vld [vmem:[%s2988_s30 + $0x111] sm:$0xff] }
  0xf4   : > { %1164 = vrot.lane.b32.xlu1 %v3267_v15, %s2868_s10  ;;  %1005 = vrot.lane.b32.xlu0 %v3174_v43, %s2867_s7  ;;  %v1919_v43 = vld [vmem:[%s4144_s1 + $0x60] sm:$0xff] }
  0xf5   : > { %2613 = vmatprep.subr.mxu0 %v1919_v43  ;;  %2690 = vmatprep.subr.mxu1 %v1919_v43 }
  0xf6   : > { %v625_v16 = vpop.permute.xlu1 %624  ;;  %v623_v44 = vpop.permute.xlu0 %622  ;;  %2614 = vmatpush3.msra.mxu0 %v1919_v43  ;;  %2706 = vmatpush3.msra.mxu1 %v1919_v43 }
  0xf7   : > { %700 = vst.msk [vmem:[#allocation2 + $0xa8] sm:$0xff] %vm678_vm3, %v625_v16  ;;  %699 = vst.msk [vmem:[#allocation2 + $0xa0] sm:$0xff] %vm678_vm3, %v623_v44  ;;  %v4166_v44 = vld [vmem:[#allocation7_spill] sm:$0xff] }
  0xf8   : > { %1166 = vrot.lane.b32.xlu1 %v3264_v14, %s2868_s10  ;;  %1196 = vrot.lane.b32.xlu0 %v3317_v31, %s2868_s10  ;;  %v1918_v14 = vld [vmem:[%s4144_s1 + $0x58] sm:$0xff] }
  0xf9   : > { %2615 = vmatprep.subr.mxu0 %v1918_v14  ;;  %2691 = vmatprep.subr.mxu1 %v1918_v14 }
  0xfa   : > { %v629_v15 = vpop.permute.xlu1 %628  ;;  %v627_v35 = vpop.permute.xlu0 %626  ;;  %2616 = vmatpush3.msra.mxu0 %v1918_v14  ;;  %2707 = vmatpush3.msra.mxu1 %v1918_v14 }
  0xfb   : > { %702 = vst.msk [vmem:[#allocation2 + $0xb8] sm:$0xff] %vm678_vm3, %v629_v15  ;;  %701 = vst.msk [vmem:[#allocation2 + $0xb0] sm:$0xff] %vm678_vm3, %v627_v35  ;;  %2617 = vmatprep.subr.mxu0 %v1917_v37  ;;  %2692 = vmatprep.subr.mxu1 %v1917_v37  ;;  %v4167_v15 = vld [vmem:[#allocation9_spill] sm:$0xff] }
  0xfc   : > { %1360 = vrot.lane.b32.xlu1 %v3067_v21, %s2869_s29  ;;  %1198 = vrot.lane.b32.xlu0 %v3314_v4, %s2868_s10  ;;  %v1916_v21 = vld [vmem:[%s4144_s1 + $0x48] sm:$0xff] }
  0xfd   : > { %2618 = vmatpush3.msra.mxu0 %v1917_v37  ;;  %2708 = vmatpush3.msra.mxu1 %v1917_v37  ;;  %v2492_v37 = vld [vmem:[%s2988_s30 + $0x61] sm:$0xff] }
  0xfe   : > { %v633_v31 = vpop.permute.xlu1 %632  ;;  %v631_v36 = vpop.permute.xlu0 %630  ;;  %2619 = vmatprep.subr.mxu0 %v1916_v21  ;;  %2693 = vmatprep.subr.mxu1 %v1916_v21 }
  0xff   : > { %704 = vst.msk [vmem:[#allocation2 + $0xc8] sm:$0xff] %vm678_vm3, %v633_v31  ;;  %703 = vst.msk [vmem:[#allocation2 + $0xc0] sm:$0xff] %vm678_vm3, %v631_v36  ;;  %2620 = vmatpush3.msra.mxu0 %v1916_v21  ;;  %2709 = vmatpush3.msra.mxu1 %v1916_v21 }
 0x100   : > { %1362 = vrot.lane.b32.xlu1 %v3064_v20, %s2869_s29  ;;  %1392 = vrot.lane.b32.xlu0 %v3157_v40, %s2869_s29  ;;  %v1915_v20 = vld [vmem:[%s4144_s1 + $0x40] sm:$0xff] }
 0x101   : > { %2621 = vmatprep.subr.mxu0 %v1915_v20  ;;  %2694 = vmatprep.subr.mxu1 %v1915_v20 }
 0x102   : > { %v637_v4 = vpop.permute.xlu1 %636  ;;  %v635_v38 = vpop.permute.xlu0 %634  ;;  %2622 = vmatpush3.msra.mxu0 %v1915_v20  ;;  %2710 = vmatpush3.msra.mxu1 %v1915_v20  ;;  %v2493_v20 = vld [vmem:[%s2988_s30 + $0x69] sm:$0xff] }
 0x103   : > { %706 = vst.msk [vmem:[#allocation2 + $0xd8] sm:$0xff] %vm678_vm3, %v637_v4  ;;  %705 = vst.msk [vmem:[#allocation2 + $0xd0] sm:$0xff] %vm678_vm3, %v635_v38  ;;  %2623 = vmatprep.subr.mxu0 %v1914_v60  ;;  %2695 = vmatprep.subr.mxu1 %v1914_v60  ;;  %v2509_v38 = vld [vmem:[%s2988_s30 + $0x129] sm:$0xff] }
 0x104   : > { %1553 = vrot.lane.b32.xlu1 %v3008_v6, %s2870_s19  ;;  %1394 = vrot.lane.b32.xlu0 %v3148_v39, %s2869_s29  ;;  %v1913_v6 = vld [vmem:[%s4144_s1 + $0x30] sm:$0xff] }
 0x105   : > { %2624 = vmatpush3.msra.mxu0 %v1914_v60  ;;  %2711 = vmatpush3.msra.mxu1 %v1914_v60  ;;  %v2524_v60 = vld [vmem:[%s2988_s30 + $0x62] sm:$0xff] }
 0x106   : > { %v641_v40 = vpop.permute.xlu1 %640  ;;  %v639_v59 = vpop.permute.xlu0 %638  ;;  %2625 = vmatprep.subr.mxu0 %v1913_v6  ;;  %2696 = vmatprep.subr.mxu1 %v1913_v6 }
 0x107   : > { %708 = vst.msk [vmem:[#allocation2 + $0xe8] sm:$0xff] %vm678_vm3, %v641_v40  ;;  %707 = vst.msk [vmem:[#allocation2 + $0xe0] sm:$0xff] %vm678_vm3, %v639_v59  ;;  %2626 = vmatpush3.msra.mxu0 %v1913_v6  ;;  %2712 = vmatpush3.msra.mxu1 %v1913_v6 }
 0x108   : > { %1007 = vrot.lane.b32.xlu1 %v3197_v48, %s2867_s7  ;;  %1585 = vrot.lane.b32.xlu0 %v3197_v48, %s2870_s19 }
 0x109   : > { %2627 = vmatprep.subr.mxu0 %v1912_v17  ;;  %2697 = vmatprep.subr.mxu1 %v1912_v17 }
 0x10a   : > { %v645_v39 = vpop.permute.xlu1 %644  ;;  %v643_v13 = vpop.permute.xlu0 %642  ;;  %2628 = vmatpush3.msra.mxu0 %v1912_v17  ;;  %2713 = vmatpush3.msra.mxu1 %v1912_v17 }
 0x10b   : > { %710 = vst.msk [vmem:[#allocation2 + $0xf8] sm:$0xff] %vm678_vm3, %v645_v39  ;;  %709 = vst.msk [vmem:[#allocation2 + $0xf0] sm:$0xff] %vm678_vm3, %v643_v13  ;;  %2629 = vmatprep.subr.mxu0 %v1911_v62  ;;  %2698 = vmatprep.subr.mxu1 %v1911_v62 }
 0x10c   : > { %1587 = vrot.lane.b32.xlu1 %v3194_v47, %s2870_s19  ;;  %1555 = vrot.lane.b32.xlu0 %v3005_v5, %s2870_s19  ;;  %v1910_v5 = vld [vmem:[%s4144_s1 + $0x18] sm:$0xff] }
 0x10d   : > { %2630 = vmatpush3.msra.mxu0 %v1911_v62  ;;  %2714 = vmatpush3.msra.mxu1 %v1911_v62 }
 0x10e   : > { %v781_v48 = vpop.permute.xlu1 %780  ;;  %v779_v61 = vpop.permute.xlu0 %778  ;;  %2631 = vmatprep.subr.mxu0 %v1910_v5  ;;  %2699 = vmatprep.subr.mxu1 %v1910_v5 }
 0x10f   : > { %876 = vst.msk [vmem:[#allocation2 + $0x8] sm:$0xff] %vm874_vm4, %v781_v48  ;;  %875 = vst.msk [vmem:[#allocation2] sm:$0xff] %vm874_vm4, %v779_v61  ;;  %2632 = vmatpush3.msra.mxu0 %v1910_v5  ;;  %2715 = vmatpush3.msra.mxu1 %v1910_v5  ;;  %v2525_v48 = vld [vmem:[%s2988_s30 + $0x6a] sm:$0xff] }
 0x110   : > { %1778 = vrot.lane.b32.xlu1 %v3327_v56, %s2871_s9  ;;  %1746 = vrot.lane.b32.xlu0 %v3277_v19, %s2871_s9  ;;  %v2541_v5 = vld [vmem:[%s2988_s30 + $0x12a] sm:$0xff] }
 0x111   : > { %2633 = vmatprep.subr.mxu0 %v1909_v63  ;;  %2700 = vmatprep.subr.mxu1 %v1909_v63 }
 0x112   : > { %v785_v2 = vpop.permute.xlu1 %784  ;;  %v783_v22 = vpop.permute.xlu0 %782  ;;  %2634 = vmatpush3.msra.mxu0 %v1909_v63  ;;  %2716 = vmatpush3.msra.mxu1 %v1909_v63 }
 0x113   : > { %878 = vst.msk [vmem:[#allocation2 + $0x18] sm:$0xff] %vm874_vm4, %v785_v2  ;;  %877 = vst.msk [vmem:[#allocation2 + $0x10] sm:$0xff] %vm874_vm4, %v783_v22  ;;  %2635 = vmatprep.subr.mxu0 %v1908_v51  ;;  %2701 = vmatprep.subr.mxu1 %v1908_v51 }
 0x114   : > { %1168 = vrot.lane.b32.xlu1 %v3277_v19, %s2868_s10  ;;  %1009 = vrot.lane.b32.xlu0 %v3194_v47, %s2867_s7  ;;  %v1907_v47 = vld [vmem:[%s4144_s1] sm:$0xff] }
 0x115   : > { %2636 = vmatpush3.msra.mxu0 %v1908_v51  ;;  %2717 = vmatpush3.msra.mxu1 %v1908_v51 }
 0x116   : > { %v789_v0 = vpop.permute.xlu1 %788  ;;  %v787_v53 = vpop.permute.xlu0 %786  ;;  %2637 = vmatprep.subr.mxu0 %v1907_v47  ;;  %2702 = vmatprep.subr.mxu1 %v1907_v47 }
 0x117   : > { %880 = vst.msk [vmem:[#allocation2 + $0x28] sm:$0xff] %vm874_vm4, %v789_v0  ;;  %879 = vst.msk [vmem:[#allocation2 + $0x20] sm:$0xff] %vm874_vm4, %v787_v53  ;;  %2638 = vmatpush3.msra.mxu0 %v1907_v47  ;;  %2718 = vmatpush3.msra.mxu1 %v1907_v47  ;;  %v2494_v47 = vld [vmem:[%s2988_s30 + $0x79] sm:$0xff] }
 0x118   : > { %1748 = vrot.lane.b32.xlu1 %v3274_v18, %s2871_s9  ;;  %1200 = vrot.lane.b32.xlu0 %v3327_v56, %s2868_s10 }
 0x11a   : > { %v793_v19 = vpop.permute.xlu1 %792  ;;  %v791_v57 = vpop.permute.xlu0 %790 }
 0x11b   : > { %882 = vst.msk [vmem:[#allocation2 + $0x38] sm:$0xff] %vm874_vm4, %v793_v19  ;;  %881 = vst.msk [vmem:[#allocation2 + $0x30] sm:$0xff] %vm874_vm4, %v791_v57  ;;  %v2416_v57 = vld [vmem:[%s2988_s30 + $0x139] sm:$0xff] }
 0x11c   : > { %1170 = vrot.lane.b32.xlu1 %v3274_v18, %s2868_s10  ;;  %1780 = vrot.lane.b32.xlu0 %v3324_v55, %s2871_s9 }
 0x11e   : > { %v797_v56 = vpop.permute.xlu1 %796  ;;  %v795_v58 = vpop.permute.xlu0 %794 }
 0x11f   : > { %884 = vst.msk [vmem:[#allocation2 + $0x48] sm:$0xff] %vm874_vm4, %v797_v56  ;;  %883 = vst.msk [vmem:[#allocation2 + $0x40] sm:$0xff] %vm874_vm4, %v795_v58  ;;  %v2511_v56 = vld [vmem:[%s2988_s30 + $0x141] sm:$0xff] }
 0x120   : > { %1364 = vrot.lane.b32.xlu1 %v3083_v24, %s2869_s29  ;;  %1202 = vrot.lane.b32.xlu0 %v3324_v55, %s2868_s10  ;;  %v2495_v58 = vld [vmem:[%s2988_s30 + $0x81] sm:$0xff] }
 0x122   : > { %v801_v30 = vpop.permute.xlu1 %800  ;;  %v799_v18 = vpop.permute.xlu0 %798 }
 0x123   : > { %886 = vst.msk [vmem:[#allocation2 + $0x58] sm:$0xff] %vm874_vm4, %v801_v30  ;;  %885 = vst.msk [vmem:[#allocation2 + $0x50] sm:$0xff] %vm874_vm4, %v799_v18 }
 0x124   : > { %1366 = vrot.lane.b32.xlu1 %v3078_v23, %s2869_s29  ;;  %1396 = vrot.lane.b32.xlu0 %v3163_v42, %s2869_s29  ;;  %v2491_v23 = vld [vmem:[%s2988_s30 + $0x51] sm:$0xff] }
 0x126   : > { %v805_v1 = vpop.permute.xlu1 %804  ;;  %v803_v3 = vpop.permute.xlu0 %802 }
 0x127   : > { %888 = vst.msk [vmem:[#allocation2 + $0x68] sm:$0xff] %vm874_vm4, %v805_v1  ;;  %887 = vst.msk [vmem:[#allocation2 + $0x60] sm:$0xff] %vm874_vm4, %v803_v3 }
 0x128   : > { %1557 = vrot.lane.b32.xlu1 %v2490_v29, %s2870_s19  ;;  %1398 = vrot.lane.b32.xlu0 %v3160_v41, %s2869_s29  ;;  %v4163_v41 = vld [vmem:[#allocation6_spill] sm:$0xff] }
 0x129   : > { %v2526_v29 = vld [vmem:[%s2988_s30 + $0x7a] sm:$0xff] }
 0x12a   : > { %v809_v24 = vpop.permute.xlu1 %808  ;;  %v807_v55 = vpop.permute.xlu0 %806 }
 0x12b   : > { %890 = vst.msk [vmem:[#allocation2 + $0x78] sm:$0xff] %vm874_vm4, %v809_v24  ;;  %889 = vst.msk [vmem:[#allocation2 + $0x70] sm:$0xff] %vm874_vm4, %v807_v55 }
 0x12c   : > { %1011 = vrot.lane.b32.xlu1 %v3217_v52, %s2867_s7  ;;  %1589 = vrot.lane.b32.xlu0 %v3217_v52, %s2870_s19  ;;  %v4164_v52 = vld [vmem:[#allocation10_spill] sm:$0xff] }
 0x12e   : > { %v813_v42 = vpop.permute.xlu1 %812  ;;  %v811_v32 = vpop.permute.xlu0 %810 }
 0x12f   : > { %892 = vst.msk [vmem:[#allocation2 + $0x88] sm:$0xff] %vm874_vm4, %v813_v42  ;;  %891 = vst.msk [vmem:[#allocation2 + $0x80] sm:$0xff] %vm874_vm4, %v811_v32 }
 0x130   : > { %1591 = vrot.lane.b32.xlu1 %v4163_v41, %s2870_s19  ;;  %1559 = vrot.lane.b32.xlu0 %v2491_v23, %s2870_s19  ;;  %v2527_v23 = vld [vmem:[%s2988_s30 + $0x82] sm:$0xff] }
 0x131   : > { %v2543_v41 = vld [vmem:[%s2988_s30 + $0x142] sm:$0xff] }
 0x132   : > { %v817_v33 = vpop.permute.xlu1 %816  ;;  %v815_v7 = vpop.permute.xlu0 %814 }
 0x133   : > { %894 = vst.msk [vmem:[#allocation2 + $0x98] sm:$0xff] %vm874_vm4, %v817_v33  ;;  %893 = vst.msk [vmem:[#allocation2 + $0x90] sm:$0xff] %vm874_vm4, %v815_v7 }
 0x134   : > { %1782 = vrot.lane.b32.xlu1 %v4164_v52, %s2871_s9  ;;  %1750 = vrot.lane.b32.xlu0 %v4165_v8, %s2871_s9 }
 0x136   : > { %v821_v10 = vpop.permute.xlu1 %820  ;;  %v819_v11 = vpop.permute.xlu0 %818 }
 0x137   : > { %896 = vst.msk [vmem:[#allocation2 + $0xa8] sm:$0xff] %vm874_vm4, %v821_v10  ;;  %895 = vst.msk [vmem:[#allocation2 + $0xa0] sm:$0xff] %vm874_vm4, %v819_v11 }
 0x138   : > { %1172 = vrot.lane.b32.xlu1 %v4165_v8, %s2868_s10  ;;  %1013 = vrot.lane.b32.xlu0 %v2413_v9, %s2867_s7 }
 0x13a   : > { %v825_v12 = vpop.permute.xlu1 %824  ;;  %v823_v16 = vpop.permute.xlu0 %822 }
 0x13b   : > { %898 = vst.msk [vmem:[#allocation2 + $0xb8] sm:$0xff] %vm874_vm4, %v825_v12  ;;  %897 = vst.msk [vmem:[#allocation2 + $0xb0] sm:$0xff] %vm874_vm4, %v823_v16  ;;  %v2465_v12 = vld [vmem:[%s2988_s30 + $0x98] sm:$0xff] }
 0x13c   : > { %1752 = vrot.lane.b32.xlu1 %v4166_v44, %s2871_s9  ;;  %1204 = vrot.lane.b32.xlu0 %v4164_v52, %s2868_s10  ;;  %v2464_v52 = vld [vmem:[%s2988_s30 + $0x90] sm:$0xff] }
 0x13e   : > { %v829_v34 = vpop.permute.xlu1 %828  ;;  %v827_v43 = vpop.permute.xlu0 %826 }
 0x13f   : > { %900 = vst.msk [vmem:[#allocation2 + $0xc8] sm:$0xff] %vm874_vm4, %v829_v34  ;;  %899 = vst.msk [vmem:[#allocation2 + $0xc0] sm:$0xff] %vm874_vm4, %v827_v43  ;;  %v2496_v34 = vld [vmem:[%s2988_s30 + $0x91] sm:$0xff] }
 0x140   : > { %1174 = vrot.lane.b32.xlu1 %v4166_v44, %s2868_s10  ;;  %1784 = vrot.lane.b32.xlu0 %v4167_v15, %s2871_s9  ;;  %v2481_v43 = vld [vmem:[%s2988_s30 + $0x158] sm:$0xff] }
 0x142   : > { %v833_v35 = vpop.permute.xlu1 %832  ;;  %v831_v14 = vpop.permute.xlu0 %830 }
 0x143   : > { %902 = vst.msk [vmem:[#allocation2 + $0xd8] sm:$0xff] %vm874_vm4, %v833_v35  ;;  %901 = vst.msk [vmem:[#allocation2 + $0xd0] sm:$0xff] %vm874_vm4, %v831_v14 }
 0x144   : > { %1368 = vrot.lane.b32.xlu1 %v3089_v26, %s2869_s29  ;;  %1206 = vrot.lane.b32.xlu0 %v4167_v15, %s2868_s10 }
 0x146   : > { %v837_v31 = vpop.permute.xlu1 %836  ;;  %v835_v36 = vpop.permute.xlu0 %834 }
 0x147   : > { %904 = vst.msk [vmem:[#allocation2 + $0xe8] sm:$0xff] %vm874_vm4, %v837_v31  ;;  %903 = vst.msk [vmem:[#allocation2 + $0xe0] sm:$0xff] %vm874_vm4, %v835_v36  ;;  %v2418_v31 = vld [vmem:[%s2988_s30 + $0x151] sm:$0xff] }
 0x148   : > { %1370 = vrot.lane.b32.xlu1 %v3086_v25, %s2869_s29  ;;  %1400 = vrot.lane.b32.xlu0 %v3183_v46, %s2869_s29  ;;  %v2414_v25 = vld [vmem:[%s2988_s30 + $0x121] sm:$0xff] }
 0x14a   : > { %v841_v26 = vpop.permute.xlu1 %840  ;;  %v839_v21 = vpop.permute.xlu0 %838 }
 0x14b   : > { %906 = vst.msk [vmem:[#allocation2 + $0xf8] sm:$0xff] %vm874_vm4, %v841_v26  ;;  %905 = vst.msk [vmem:[#allocation2 + $0xf0] sm:$0xff] %vm874_vm4, %v839_v21  ;;  %v2513_v26 = vld [vmem:[%s2988_s30 + $0x159] sm:$0xff] }
 0x14c   : > { %1561 = vrot.lane.b32.xlu1 %v2492_v37, %s2870_s19  ;;  %1402 = vrot.lane.b32.xlu0 %v3180_v45, %s2869_s29  ;;  %v2540_v45 = vld [vmem:[%s2988_s30 + $0x122] sm:$0xff]  ;;  %v2497_v21 = vld [vmem:[%s2988_s30 + $0x99] sm:$0xff] }
 0x14e   : > { %v974_v4 = vpop.permute.xlu1 %973  ;;  %v972_v46 = vpop.permute.xlu0 %971 }
 0x14f   : > { %1069 = vst.msk [vmem:[#allocation2 + $0x8] sm:$0xff] %vm1067_vm5, %v974_v4  ;;  %1068 = vst.msk [vmem:[#allocation2] sm:$0xff] %vm1067_vm5, %v972_v46  ;;  %v2544_v46 = vld [vmem:[%s2988_s30 + $0x152] sm:$0xff] }
 0x150   : > { %1015 = vrot.lane.b32.xlu1 %v2414_v25, %s2867_s7  ;;  %1593 = vrot.lane.b32.xlu0 %v2414_v25, %s2870_s19 }
 0x152   : > { %v978_v40 = vpop.permute.xlu1 %977  ;;  %v976_v59 = vpop.permute.xlu0 %975 }
 0x153   : > { %1071 = vst.msk [vmem:[#allocation2 + $0x18] sm:$0xff] %vm1067_vm5, %v978_v40  ;;  %1070 = vst.msk [vmem:[#allocation2 + $0x10] sm:$0xff] %vm1067_vm5, %v976_v59 }
 0x154   : > { %1595 = vrot.lane.b32.xlu1 %v2509_v38, %s2870_s19  ;;  %1563 = vrot.lane.b32.xlu0 %v2493_v20, %s2870_s19 }
 0x156   : > { %v982_v6 = vpop.permute.xlu1 %981  ;;  %v980_v39 = vpop.permute.xlu0 %979 }
 0x157   : > { %1073 = vst.msk [vmem:[#allocation2 + $0x28] sm:$0xff] %vm1067_vm5, %v982_v6  ;;  %1072 = vst.msk [vmem:[#allocation2 + $0x20] sm:$0xff] %vm1067_vm5, %v980_v39  ;;  %v2545_v39 = vld [vmem:[%s2988_s30 + $0x15a] sm:$0xff] }
 0x158   : > { %1786 = vrot.lane.b32.xlu1 %v2540_v45, %s2871_s9  ;;  %1754 = vrot.lane.b32.xlu0 %v2524_v60, %s2871_s9 }
 0x15a   : > { %v986_v13 = vpop.permute.xlu1 %985  ;;  %v984_v17 = vpop.permute.xlu0 %983 }
 0x15b   : > { %1075 = vst.msk [vmem:[#allocation2 + $0x38] sm:$0xff] %vm1067_vm5, %v986_v13  ;;  %1074 = vst.msk [vmem:[#allocation2 + $0x30] sm:$0xff] %vm1067_vm5, %v984_v17  ;;  %v2529_v13 = vld [vmem:[%s2988_s30 + $0x9a] sm:$0xff] }
 0x15c   : > { %1176 = vrot.lane.b32.xlu1 %v2524_v60, %s2868_s10  ;;  %1017 = vrot.lane.b32.xlu0 %v2509_v38, %s2867_s7  ;;  %v2528_v38 = vld [vmem:[%s2988_s30 + $0x92] sm:$0xff] }
 0x15e   : > { %v990_v61 = vpop.permute.xlu1 %989  ;;  %v988_v62 = vpop.permute.xlu0 %987 }
 0x15f   : > { %1077 = vst.msk [vmem:[#allocation2 + $0x48] sm:$0xff] %vm1067_vm5, %v990_v61  ;;  %1076 = vst.msk [vmem:[#allocation2 + $0x40] sm:$0xff] %vm1067_vm5, %v988_v62 }
 0x160   : > { %1756 = vrot.lane.b32.xlu1 %v2525_v48, %s2871_s9  ;;  %1208 = vrot.lane.b32.xlu0 %v2540_v45, %s2868_s10 }
 0x162   : > { %v1004_v2 = vpop.permute.xlu1 %1003  ;;  %v992_v22 = vpop.permute.xlu0 %991 }
 0x163   : > { %1084 = vst.msk [vmem:[#allocation2 + $0x80] sm:$0xff] %vm1067_vm5, %v1004_v2  ;;  %1078 = vst.msk [vmem:[#allocation2 + $0x50] sm:$0xff] %vm1067_vm5, %v992_v22  ;;  %v2482_v22 = vld [vmem:[%s2988_s30 + $0x168] sm:$0xff] }
 0x164   : > { %1178 = vrot.lane.b32.xlu1 %v2525_v48, %s2868_s10  ;;  %1788 = vrot.lane.b32.xlu0 %v2541_v5, %s2871_s9 }
 0x166   : > { %v1165_v63 = vpop.permute.xlu1 %1164  ;;  %v1006_v0 = vpop.permute.xlu0 %1005 }
 0x167   : > { %1261 = vst.msk [vmem:[#allocation2] sm:$0xff] %vm1260_vm6, %v1165_v63  ;;  %v2466_v63 = vld [vmem:[%s2988_s30 + $0xa8] sm:$0xff] }
 0x168   : > { %1085 = vst.msk [vmem:[#allocation2 + $0x88] sm:$0xff] %vm1067_vm5, %v1006_v0  ;;  %1372 = vrot.lane.b32.xlu1 %v3101_v28, %s2869_s29  ;;  %1210 = vrot.lane.b32.xlu0 %v2541_v5, %s2868_s10 }
 0x16a   : > { %v1167_v53 = vpop.permute.xlu1 %1166  ;;  %v1197_v51 = vpop.permute.xlu0 %1196 }
 0x16b   : > { %1262 = vst.msk [vmem:[#allocation2 + $0x8] sm:$0xff] %vm1260_vm6, %v1167_v53  ;;  %1277 = vst.msk [vmem:[#allocation2 + $0x80] sm:$0xff] %vm1260_vm6, %v1197_v51  ;;  %v2483_v51 = vld [vmem:[%s2988_s30 + $0x170] sm:$0xff] }
 0x16c   : > { %1374 = vrot.lane.b32.xlu1 %v3098_v27, %s2869_s29  ;;  %1404 = vrot.lane.b32.xlu0 %v3203_v50, %s2869_s29 }
 0x16e   : > { %v1361_v28 = vpop.permute.xlu1 %1360  ;;  %v1199_v19 = vpop.permute.xlu0 %1198 }
 0x16f   : > { %1457 = vst.msk [vmem:[#allocation2] sm:$0xff] %vm1456_vm7, %v1361_v28 }
 0x170   : > { %1278 = vst.msk [vmem:[#allocation2 + $0x88] sm:$0xff] %vm1260_vm6, %v1199_v19  ;;  %1565 = vrot.lane.b32.xlu1 %v2494_v47, %s2870_s19  ;;  %1406 = vrot.lane.b32.xlu0 %v3200_v49, %s2869_s29  ;;  %v2542_v49 = vld [vmem:[%s2988_s30 + $0x13a] sm:$0xff]  ;;  %v2467_v47 = vld [vmem:[%s2988_s30 + $0xb0] sm:$0xff] }
 0x172   : > { %v1363_v27 = vpop.permute.xlu1 %1362  ;;  %v1393_v50 = vpop.permute.xlu0 %1392 }
 0x173   : > { %1458 = vst.msk [vmem:[#allocation2 + $0x8] sm:$0xff] %vm1456_vm7, %v1363_v27  ;;  %1473 = vst.msk [vmem:[#allocation2 + $0x80] sm:$0xff] %vm1456_vm7, %v1393_v50  ;;  %v2514_v27 = vld [vmem:[%s2988_s30 + $0x169] sm:$0xff] }
 0x174   : > { %1019 = vrot.lane.b32.xlu1 %v2416_v57, %s2867_s7  ;;  %1597 = vrot.lane.b32.xlu0 %v2416_v57, %s2870_s19  ;;  %v2498_v50 = vld [vmem:[%s2988_s30 + $0xa9] sm:$0xff] }
 0x176   : > { %v1554_v30 = vpop.permute.xlu1 %1553  ;;  %v1395_v18 = vpop.permute.xlu0 %1394 }
 0x177   : > { %1650 = vst.msk [vmem:[#allocation2] sm:$0xff] %vm1649_vm8, %v1554_v30 }
 0x178   : > { %1474 = vst.msk [vmem:[#allocation2 + $0x88] sm:$0xff] %vm1456_vm7, %v1395_v18  ;;  %1599 = vrot.lane.b32.xlu1 %v2511_v56, %s2870_s19  ;;  %1567 = vrot.lane.b32.xlu0 %v2495_v58, %s2870_s19 }
 0x17a   : > { %v1008_v1 = vpop.permute.xlu1 %1007  ;;  %v1586_v3 = vpop.permute.xlu0 %1585 }
 0x17b   : > { %1086 = vst.msk [vmem:[#allocation2 + $0x90] sm:$0xff] %vm1067_vm5, %v1008_v1  ;;  %v2499_v1 = vld [vmem:[%s2988_s30 + $0xb1] sm:$0xff] }
 0x17c   : > { %1666 = vst.msk [vmem:[#allocation2 + $0x80] sm:$0xff] %vm1649_vm8, %v1586_v3  ;;  %1790 = vrot.lane.b32.xlu1 %v2542_v49, %s2871_s9  ;;  %1758 = vrot.lane.b32.xlu0 %v2526_v29, %s2871_s9 }
 0x17e   : > { %v1588_v24 = vpop.permute.xlu1 %1587  ;;  %v1556_v55 = vpop.permute.xlu0 %1555 }
 0x17f   : > { %1667 = vst.msk [vmem:[#allocation2 + $0x88] sm:$0xff] %vm1649_vm8, %v1588_v24  ;;  %1651 = vst.msk [vmem:[#allocation2 + $0x8] sm:$0xff] %vm1649_vm8, %v1556_v55  ;;  %v2546_v55 = vld [vmem:[%s2988_s30 + $0x16a] sm:$0xff] }
 0x180   : > { %1180 = vrot.lane.b32.xlu1 %v2526_v29, %s2868_s10  ;;  %1021 = vrot.lane.b32.xlu0 %v2511_v56, %s2867_s7  ;;  %v2515_v29 = vld [vmem:[%s2988_s30 + $0x171] sm:$0xff] }
 0x182   : > { %v1779_v42 = vpop.permute.xlu1 %1778  ;;  %v1747_v32 = vpop.permute.xlu0 %1746 }
 0x183   : > { %1859 = vst.msk [vmem:[#allocation2 + $0x80] sm:$0xff] %vm1842_vm9, %v1779_v42  ;;  %1843 = vst.msk [vmem:[#allocation2] sm:$0xff] %vm1842_vm9, %v1747_v32 }
 0x184   : > { %1760 = vrot.lane.b32.xlu1 %v2527_v23, %s2871_s9  ;;  %1212 = vrot.lane.b32.xlu0 %v2542_v49, %s2868_s10 }
 0x186   : > { %v1169_v33 = vpop.permute.xlu1 %1168  ;;  %v1010_v7 = vpop.permute.xlu0 %1009 }
 0x187   : > { %1263 = vst.msk [vmem:[#allocation2 + $0x10] sm:$0xff] %vm1260_vm6, %v1169_v33 }
 0x188   : > { %1087 = vst.msk [vmem:[#allocation2 + $0x98] sm:$0xff] %vm1067_vm5, %v1010_v7  ;;  %1182 = vrot.lane.b32.xlu1 %v2527_v23, %s2868_s10  ;;  %1792 = vrot.lane.b32.xlu0 %v2543_v41, %s2871_s9  ;;  %v2530_v23 = vld [vmem:[%s2988_s30 + $0xaa] sm:$0xff] }
 0x18a   : > { %v1749_v8 = vpop.permute.xlu1 %1748  ;;  %v1201_v9 = vpop.permute.xlu0 %1200  ;;  %v1875_v10 = vld [vmem:[#allocation2] sm:$0xff] }
 0x18b   : > { %v1891_v11 = vld [vmem:[#allocation2 + $0x80] sm:$0xff]  ;;  %1844 = vst.msk [vmem:[#allocation2 + $0x8] sm:$0xff] %vm1842_vm9, %v1749_v8  ;;  %2639 = vmatprep.mubr.f32.mxu0 %v1875_v10  ;;  %v2547_v8 = vld [vmem:[%s2988_s30 + $0x172] sm:$0xff] }
 0x18c   : > { %1279 = vst.msk [vmem:[#allocation2 + $0x90] sm:$0xff] %vm1260_vm6, %v1201_v9  ;;  %2663 = vmatprep.mubr.f32.mxu1 %v1891_v11  ;;  %1376 = vrot.lane.b32.xlu1 %v2464_v52, %s2869_s29  ;;  %v2531_v9 = vld [vmem:[%s2988_s30 + $0xb2] sm:$0xff] }
 0x18d   : > { %1214 = vrot.lane.b32.xlu0 %v2543_v41, %s2868_s10 }
 0x18e   : > { %v1171_v16 = vpop.permute.xlu1 %1170  ;;  %v1781_v44 = vpop.permute.xlu0 %1780 }
 0x18f   : > { %1264 = vst.msk [vmem:[#allocation2 + $0x18] sm:$0xff] %vm1260_vm6, %v1171_v16 }
 0x190   : > { %1860 = vst.msk [vmem:[#allocation2 + $0x88] sm:$0xff] %vm1842_vm9, %v1781_v44  ;;  %1378 = vrot.lane.b32.xlu1 %v2465_v12, %s2869_s29 }
 0x191   : > { %1408 = vrot.lane.b32.xlu0 %v3223_v54, %s2869_s29 }
 0x192   : > { %v1365_v15 = vpop.permute.xlu1 %1364  ;;  %v1203_v35 = vpop.permute.xlu0 %1202  ;;  %v1876_v14 = vld [vmem:[#allocation2 + $0x8] sm:$0xff] }
 0x193   : > { %1459 = vst.msk [vmem:[#allocation2 + $0x10] sm:$0xff] %vm1456_vm7, %v1365_v15  ;;  %2640 = vmatmul.mubr.f32.vlgmr.msra.gmra.mxu0 %v1876_v14  ;;  %v2468_v15 = vld [vmem:[%s2988_s30 + $0xc0] sm:$0xff] }
 0x194   : > { %1280 = vst.msk [vmem:[#allocation2 + $0x98] sm:$0xff] %vm1260_vm6, %v1203_v35  ;;  %1569 = vrot.lane.b32.xlu1 %v2496_v34, %s2870_s19 }
 0x195   : > { %1410 = vrot.lane.b32.xlu0 %v2481_v43, %s2869_s29  ;;  %v2484_v43 = vld [vmem:[%s2988_s30 + $0x180] sm:$0xff] }
 0x196   : > { %v1367_v36 = vpop.permute.xlu1 %1366  ;;  %v1397_v54 = vpop.permute.xlu0 %1396 }
 0x197   : > { %v1892_v37 = vld [vmem:[#allocation2 + $0x88] sm:$0xff]  ;;  %1460 = vst.msk [vmem:[#allocation2 + $0x18] sm:$0xff] %vm1456_vm7, %v1367_v36  ;;  %1475 = vst.msk [vmem:[#allocation2 + $0x90] sm:$0xff] %vm1456_vm7, %v1397_v54 }
 0x198   : > { %2664 = vmatmul.mubr.f32.vlgmr.msra.gmra.mxu1 %v1892_v37  ;;  %1023 = vrot.lane.b32.xlu1 %v2418_v31, %s2867_s7  ;;  %v2485_v36 = vld [vmem:[%s2988_s30 + $0x188] sm:$0xff] }
 0x199   : > { %1601 = vrot.lane.b32.xlu0 %v2418_v31, %s2870_s19  ;;  %v2469_v54 = vld [vmem:[%s2988_s30 + $0xc8] sm:$0xff] }
 0x19a   : > { %v1558_v25 = vpop.permute.xlu1 %1557  ;;  %v1399_v4 = vpop.permute.xlu0 %1398 }
 0x19b   : > { %1652 = vst.msk [vmem:[#allocation2 + $0x10] sm:$0xff] %vm1649_vm8, %v1558_v25  ;;  %v2516_v25 = vld [vmem:[%s2988_s30 + $0x181] sm:$0xff] }
 0x19c   : > { %1476 = vst.msk [vmem:[#allocation2 + $0x98] sm:$0xff] %vm1456_vm7, %v1399_v4  ;;  %1603 = vrot.lane.b32.xlu1 %v2513_v26, %s2870_s19  ;;  %v2500_v4 = vld [vmem:[%s2988_s30 + $0xc1] sm:$0xff] }
 0x19d   : > { %1571 = vrot.lane.b32.xlu0 %v2497_v21, %s2870_s19 }
 0x19e   : > { %v1012_v20 = vpop.permute.xlu1 %1011  ;;  %v1590_v40 = vpop.permute.xlu0 %1589 }
 0x19f   : > { %1088 = vst.msk [vmem:[#allocation2 + $0xa0] sm:$0xff] %vm1067_vm5, %v1012_v20 }
 0x1a0   : > { %1668 = vst.msk [vmem:[#allocation2 + $0x90] sm:$0xff] %vm1649_vm8, %v1590_v40  ;;  %1794 = vrot.lane.b32.xlu1 %v2544_v46, %s2871_s9 }
 0x1a1   : > { %1762 = vrot.lane.b32.xlu0 %v2528_v38, %s2871_s9 }
 0x1a2   : > { %v1592_v59 = vpop.permute.xlu1 %1591  ;;  %v1560_v45 = vpop.permute.xlu0 %1559 }
 0x1a3   : > { %1669 = vst.msk [vmem:[#allocation2 + $0x98] sm:$0xff] %vm1649_vm8, %v1592_v59  ;;  %1653 = vst.msk [vmem:[#allocation2 + $0x18] sm:$0xff] %vm1649_vm8, %v1560_v45  ;;  %v2517_v59 = vld [vmem:[%s2988_s30 + $0x189] sm:$0xff] }
 0x1a4   : > { %1025 = vrot.lane.b32.xlu1 %v2513_v26, %s2867_s7  ;;  %v2501_v45 = vld [vmem:[%s2988_s30 + $0xc9] sm:$0xff] }
 0x1a5   : > { %993 = vrot.lane.b32.xlu0 %v2497_v21, %s2867_s7 }
 0x1a6   : > { %v1783_v60 = vpop.permute.xlu1 %1782  ;;  %v1751_v6 = vpop.permute.xlu0 %1750 }
 0x1a7   : > { %1861 = vst.msk [vmem:[#allocation2 + $0x90] sm:$0xff] %vm1842_vm9, %v1783_v60  ;;  %1845 = vst.msk [vmem:[#allocation2 + $0x10] sm:$0xff] %vm1842_vm9, %v1751_v6 }
 0x1a8   : > { %1216 = vrot.lane.b32.xlu1 %v2544_v46, %s2868_s10 }
 0x1a9   : > { %1184 = vrot.lane.b32.xlu0 %v2528_v38, %s2868_s10 }
 0x1aa   : > { %v1173_v17 = vpop.permute.xlu1 %1172  ;;  %v1014_v48 = vpop.permute.xlu0 %1013 }
 0x1ab   : > { %1265 = vst.msk [vmem:[#allocation2 + $0x20] sm:$0xff] %vm1260_vm6, %v1173_v17 }
 0x1ac   : > { %1089 = vst.msk [vmem:[#allocation2 + $0xa8] sm:$0xff] %vm1067_vm5, %v1014_v48  ;;  %1796 = vrot.lane.b32.xlu1 %v2545_v39, %s2871_s9 }
 0x1ad   : > { %1764 = vrot.lane.b32.xlu0 %v2529_v13, %s2871_s9 }
 0x1ae   : > { %v1753_v61 = vpop.permute.xlu1 %1752  ;;  %v1205_v62 = vpop.permute.xlu0 %1204  ;;  %v1877_v5 = vld [vmem:[#allocation2 + $0x10] sm:$0xff] }
 0x1af   : > { %v1893_v2 = vld [vmem:[#allocation2 + $0x90] sm:$0xff]  ;;  %1846 = vst.msk [vmem:[#allocation2 + $0x18] sm:$0xff] %vm1842_vm9, %v1753_v61  ;;  %2642 = vmatprep.mubr.f32.mxu0 %v1877_v5 }
 0x1b0   : > { %1281 = vst.msk [vmem:[#allocation2 + $0xa0] sm:$0xff] %vm1260_vm6, %v1205_v62  ;;  %2666 = vmatprep.mubr.f32.mxu1 %v1893_v2  ;;  %1218 = vrot.lane.b32.xlu1 %v2545_v39, %s2868_s10  ;;  %v2548_v39 = vld [vmem:[%s2988_s30 + $0x182] sm:$0xff] }
 0x1b1   : > { %1186 = vrot.lane.b32.xlu0 %v2529_v13, %s2868_s10  ;;  %v2532_v13 = vld [vmem:[%s2988_s30 + $0xc2] sm:$0xff] }
 0x1b2   : > { %v1175_v0 = vpop.permute.xlu1 %1174  ;;  %v1785_v53 = vpop.permute.xlu0 %1784 }
 0x1b3   : > { %1266 = vst.msk [vmem:[#allocation2 + $0x28] sm:$0xff] %vm1260_vm6, %v1175_v0  ;;  %v2549_v0 = vld [vmem:[%s2988_s30 + $0x18a] sm:$0xff] }
 0x1b4   : > { %1862 = vst.msk [vmem:[#allocation2 + $0x98] sm:$0xff] %vm1842_vm9, %v1785_v53  ;;  %1412 = vrot.lane.b32.xlu1 %v2482_v22, %s2869_s29  ;;  %v2533_v53 = vld [vmem:[%s2988_s30 + $0xca] sm:$0xff] }
 0x1b5   : > { %1380 = vrot.lane.b32.xlu0 %v2466_v63, %s2869_s29 }
 0x1b6   : > { %v1369_v28 = vpop.permute.xlu1 %1368  ;;  %v1207_v19 = vpop.permute.xlu0 %1206  ;;  %v1878_v57 = vld [vmem:[#allocation2 + $0x18] sm:$0xff] }
 0x1b7   : > { %1461 = vst.msk [vmem:[#allocation2 + $0x20] sm:$0xff] %vm1456_vm7, %v1369_v28  ;;  %2643 = vmatmul.mubr.f32.gmra.mxu0 %v1878_v57 }
 0x1b8   : > { %1282 = vst.msk [vmem:[#allocation2 + $0xa8] sm:$0xff] %vm1260_vm6, %v1207_v19  ;;  %1414 = vrot.lane.b32.xlu1 %v2483_v51, %s2869_s29 }
 0x1b9   : > { %1382 = vrot.lane.b32.xlu0 %v2467_v47, %s2869_s29 }
 0x1ba   : > { %v1371_v56 = vpop.permute.xlu1 %1370  ;;  %v1401_v58 = vpop.permute.xlu0 %1400 }
 0x1bb   : > { %v1894_v30 = vld [vmem:[#allocation2 + $0x98] sm:$0xff]  ;;  %1462 = vst.msk [vmem:[#allocation2 + $0x28] sm:$0xff] %vm1456_vm7, %v1371_v56  ;;  %1477 = vst.msk [vmem:[#allocation2 + $0xa0] sm:$0xff] %vm1456_vm7, %v1401_v58 }
 0x1bc   : > { %2667 = vmatmul.mubr.f32.gmra.mxu1 %v1894_v30  ;;  %1605 = vrot.lane.b32.xlu1 %v2514_v27, %s2870_s19 }
 0x1bd   : > { %1573 = vrot.lane.b32.xlu0 %v2498_v50, %s2870_s19 }
 0x1be   : > { %v1562_v18 = vpop.permute.xlu1 %1561  ;;  %v1403_v49 = vpop.permute.xlu0 %1402 }
 0x1bf   : > { %1654 = vst.msk [vmem:[#allocation2 + $0x20] sm:$0xff] %vm1649_vm8, %v1562_v18  ;;  %v2487_v18 = vld [vmem:[%s2988_s30 + $0x1a0] sm:$0xff] }
 0x1c0   : > { %1478 = vst.msk [vmem:[#allocation2 + $0xa8] sm:$0xff] %vm1456_vm7, %v1403_v49  ;;  %1027 = vrot.lane.b32.xlu1 %v2514_v27, %s2867_s7  ;;  %v2486_v27 = vld [vmem:[%s2988_s30 + $0x198] sm:$0xff]  ;;  %v2471_v49 = vld [vmem:[%s2988_s30 + $0xe0] sm:$0xff] }
 0x1c1   : > { %995 = vrot.lane.b32.xlu0 %v2498_v50, %s2867_s7  ;;  %v2470_v50 = vld [vmem:[%s2988_s30 + $0xd8] sm:$0xff] }
 0x1c2   : > { %v1016_v3 = vpop.permute.xlu1 %1015  ;;  %v1594_v24 = vpop.permute.xlu0 %1593 }
 0x1c3   : > { %1090 = vst.msk [vmem:[#allocation2 + $0xb0] sm:$0xff] %vm1067_vm5, %v1016_v3  ;;  %v2518_v3 = vld [vmem:[%s2988_s30 + $0x199] sm:$0xff] }
 0x1c4   : > { %1670 = vst.msk [vmem:[#allocation2 + $0xa0] sm:$0xff] %vm1649_vm8, %v1594_v24  ;;  %1607 = vrot.lane.b32.xlu1 %v2515_v29, %s2870_s19  ;;  %v2502_v24 = vld [vmem:[%s2988_s30 + $0xd9] sm:$0xff] }
 0x1c5   : > { %1575 = vrot.lane.b32.xlu0 %v2499_v1, %s2870_s19 }
 0x1c6   : > { %v1596_v42 = vpop.permute.xlu1 %1595  ;;  %v1564_v32 = vpop.permute.xlu0 %1563 }
 0x1c7   : > { %1671 = vst.msk [vmem:[#allocation2 + $0xa8] sm:$0xff] %vm1649_vm8, %v1596_v42  ;;  %1655 = vst.msk [vmem:[#allocation2 + $0x28] sm:$0xff] %vm1649_vm8, %v1564_v32  ;;  %v2519_v42 = vld [vmem:[%s2988_s30 + $0x1a1] sm:$0xff] }
 0x1c8   : > { %1798 = vrot.lane.b32.xlu1 %v2546_v55, %s2871_s9  ;;  %v2503_v32 = vld [vmem:[%s2988_s30 + $0xe1] sm:$0xff] }
 0x1c9   : > { %1766 = vrot.lane.b32.xlu0 %v2530_v23, %s2871_s9 }
 0x1ca   : > { %v1787_v41 = vpop.permute.xlu1 %1786  ;;  %v1755_v33 = vpop.permute.xlu0 %1754 }
 0x1cb   : > { %1863 = vst.msk [vmem:[#allocation2 + $0xa0] sm:$0xff] %vm1842_vm9, %v1787_v41  ;;  %1847 = vst.msk [vmem:[#allocation2 + $0x20] sm:$0xff] %vm1842_vm9, %v1755_v33 }
 0x1cc   : > { %1029 = vrot.lane.b32.xlu1 %v2515_v29, %s2867_s7 }
 0x1cd   : > { %997 = vrot.lane.b32.xlu0 %v2499_v1, %s2867_s7 }
 0x1ce   : > { %v1177_v7 = vpop.permute.xlu1 %1176  ;;  %v1018_v52 = vpop.permute.xlu0 %1017 }
 0x1cf   : > { %1267 = vst.msk [vmem:[#allocation2 + $0x30] sm:$0xff] %vm1260_vm6, %v1177_v7  ;;  %v2550_v7 = vld [vmem:[%s2988_s30 + $0x19a] sm:$0xff] }
 0x1d0   : > { %1091 = vst.msk [vmem:[#allocation2 + $0xb8] sm:$0xff] %vm1067_vm5, %v1018_v52  ;;  %1220 = vrot.lane.b32.xlu1 %v2546_v55, %s2868_s10  ;;  %v2534_v52 = vld [vmem:[%s2988_s30 + $0xda] sm:$0xff] }
 0x1d1   : > { %1188 = vrot.lane.b32.xlu0 %v2530_v23, %s2868_s10 }
 0x1d2   : > { %v1757_v10 = vpop.permute.xlu1 %1756  ;;  %v1209_v11 = vpop.permute.xlu0 %1208  ;;  %v1879_v12 = vld [vmem:[#allocation2 + $0x20] sm:$0xff] }
 0x1d3   : > { %v1895_v16 = vld [vmem:[#allocation2 + $0xa0] sm:$0xff]  ;;  %1848 = vst.msk [vmem:[#allocation2 + $0x28] sm:$0xff] %vm1842_vm9, %v1757_v10  ;;  %2645 = vmatprep.mubr.f32.mxu0 %v1879_v12 }
 0x1d4   : > { %1283 = vst.msk [vmem:[#allocation2 + $0xb0] sm:$0xff] %vm1260_vm6, %v1209_v11  ;;  %2669 = vmatprep.mubr.f32.mxu1 %v1895_v16  ;;  %1800 = vrot.lane.b32.xlu1 %v2547_v8, %s2871_s9  ;;  %v2551_v10 = vld [vmem:[%s2988_s30 + $0x1a2] sm:$0xff] }
 0x1d5   : > { %1768 = vrot.lane.b32.xlu0 %v2531_v9, %s2871_s9  ;;  %v2535_v11 = vld [vmem:[%s2988_s30 + $0xe2] sm:$0xff]  ;;  %s208_s30 = sand.u32 1, %s2845_s13  }
 0x1d6   : > { %v1179_v44 = vpop.permute.xlu1 %1178  ;;  %v1789_v34 = vpop.permute.xlu0 %1788  ;;  %s4097_s15 = scalar_lea.sflag [#allocation4], %s208_s30 }
 0x1d7   : > { %1268 = vst.msk [vmem:[#allocation2 + $0x38] sm:$0xff] %vm1260_vm6, %v1179_v44 }
 0x1d8   : > { %1864 = vst.msk [vmem:[#allocation2 + $0xa8] sm:$0xff] %vm1842_vm9, %v1789_v34  ;;  %1222 = vrot.lane.b32.xlu1 %v2547_v8, %s2868_s10 }
 0x1d9   : > { %1190 = vrot.lane.b32.xlu0 %v2531_v9, %s2868_s10 }
 0x1da   : > { %v1373_v35 = vpop.permute.xlu1 %1372  ;;  %v1211_v14 = vpop.permute.xlu0 %1210  ;;  %v1880_v31 = vld [vmem:[#allocation2 + $0x28] sm:$0xff] }
 0x1db   : > { %1463 = vst.msk [vmem:[#allocation2 + $0x30] sm:$0xff] %vm1456_vm7, %v1373_v35  ;;  %2646 = vmatmul.mubr.f32.gmra.mxu0 %v1880_v31 }
 0x1dc   : > { %1284 = vst.msk [vmem:[#allocation2 + $0xb8] sm:$0xff] %vm1260_vm6, %v1211_v14  ;;  %1416 = vrot.lane.b32.xlu1 %v2484_v43, %s2869_s29 }
 0x1dd   : > { %1384 = vrot.lane.b32.xlu0 %v2468_v15, %s2869_s29 }
 0x1de   : > { %v1375_v37 = vpop.permute.xlu1 %1374  ;;  %v1405_v26 = vpop.permute.xlu0 %1404 }
 0x1df   : > { %v1896_v21 = vld [vmem:[#allocation2 + $0xa8] sm:$0xff]  ;;  %1464 = vst.msk [vmem:[#allocation2 + $0x38] sm:$0xff] %vm1456_vm7, %v1375_v37  ;;  %1479 = vst.msk [vmem:[#allocation2 + $0xb0] sm:$0xff] %vm1456_vm7, %v1405_v26 }
 0x1e0   : > { %2670 = vmatmul.mubr.f32.gmra.mxu1 %v1896_v21  ;;  %1418 = vrot.lane.b32.xlu1 %v2485_v36, %s2869_s29 }
 0x1e1   : > { %1386 = vrot.lane.b32.xlu0 %v2469_v54, %s2869_s29 }
 0x1e2   : > { %v1566_v46 = vpop.permute.xlu1 %1565  ;;  %v1407_v38 = vpop.permute.xlu0 %1406 }
 0x1e3   : > { %1656 = vst.msk [vmem:[#allocation2 + $0x30] sm:$0xff] %vm1649_vm8, %v1566_v46 }
 0x1e4   : > { %1480 = vst.msk [vmem:[#allocation2 + $0xb8] sm:$0xff] %vm1456_vm7, %v1407_v38  ;;  %1609 = vrot.lane.b32.xlu1 %v2516_v25, %s2870_s19 }
 0x1e5   : > { %1577 = vrot.lane.b32.xlu0 %v2500_v4, %s2870_s19 }
 0x1e6   : > { %v1020_v20 = vpop.permute.xlu1 %1019  ;;  %v1598_v40 = vpop.permute.xlu0 %1597 }
 0x1e7   : > { %1092 = vst.msk [vmem:[#allocation2 + $0xc0] sm:$0xff] %vm1067_vm5, %v1020_v20 }
 0x1e8   : > { %1672 = vst.msk [vmem:[#allocation2 + $0xb0] sm:$0xff] %vm1649_vm8, %v1598_v40  ;;  %1031 = vrot.lane.b32.xlu1 %v2516_v25, %s2867_s7 }
 0x1e9   : > { %999 = vrot.lane.b32.xlu0 %v2500_v4, %s2867_s7 }
 0x1ea   : > { %v1600_v60 = vpop.permute.xlu1 %1599  ;;  %v1568_v6 = vpop.permute.xlu0 %1567 }
 0x1eb   : > { %1673 = vst.msk [vmem:[#allocation2 + $0xb8] sm:$0xff] %vm1649_vm8, %v1600_v60  ;;  %1657 = vst.msk [vmem:[#allocation2 + $0x38] sm:$0xff] %vm1649_vm8, %v1568_v6 }
 0x1ec   : > { %1611 = vrot.lane.b32.xlu1 %v2517_v59, %s2870_s19 }
 0x1ed   : > { %1579 = vrot.lane.b32.xlu0 %v2501_v45, %s2870_s19 }
 0x1ee   : > { %v1791_v17 = vpop.permute.xlu1 %1790  ;;  %v1759_v48 = vpop.permute.xlu0 %1758 }
 0x1ef   : > { %1865 = vst.msk [vmem:[#allocation2 + $0xb0] sm:$0xff] %vm1842_vm9, %v1791_v17  ;;  %1849 = vst.msk [vmem:[#allocation2 + $0x30] sm:$0xff] %vm1842_vm9, %v1759_v48 }
 0x1f0   : > { %1802 = vrot.lane.b32.xlu1 %v2548_v39, %s2871_s9 }
 0x1f1   : > { %1770 = vrot.lane.b32.xlu0 %v2532_v13, %s2871_s9 }
 0x1f2   : > { %v1181_v61 = vpop.permute.xlu1 %1180  ;;  %v1022_v62 = vpop.permute.xlu0 %1021 }
 0x1f3   : > { %1269 = vst.msk [vmem:[#allocation2 + $0x40] sm:$0xff] %vm1260_vm6, %v1181_v61 }
 0x1f4   : > { %1093 = vst.msk [vmem:[#allocation2 + $0xc8] sm:$0xff] %vm1067_vm5, %v1022_v62  ;;  %1033 = vrot.lane.b32.xlu1 %v2517_v59, %s2867_s7 }
 0x1f5   : > { %1001 = vrot.lane.b32.xlu0 %v2501_v45, %s2867_s7 }
 0x1f6   : > { %v1761_v5 = vpop.permute.xlu1 %1760  ;;  %v1213_v2 = vpop.permute.xlu0 %1212  ;;  %v1881_v22 = vld [vmem:[#allocation2 + $0x30] sm:$0xff] }
 0x1f7   : > { %v1897_v63 = vld [vmem:[#allocation2 + $0xb0] sm:$0xff]  ;;  %1850 = vst.msk [vmem:[#allocation2 + $0x38] sm:$0xff] %vm1842_vm9, %v1761_v5  ;;  %2648 = vmatprep.mubr.f32.mxu0 %v1881_v22 }
 0x1f8   : > { %1285 = vst.msk [vmem:[#allocation2 + $0xc0] sm:$0xff] %vm1260_vm6, %v1213_v2  ;;  %2672 = vmatprep.mubr.f32.mxu1 %v1897_v63  ;;  %1224 = vrot.lane.b32.xlu1 %v2548_v39, %s2868_s10 }
 0x1f9   : > { %1192 = vrot.lane.b32.xlu0 %v2532_v13, %s2868_s10 }
 0x1fa   : > { %v1183_v51 = vpop.permute.xlu1 %1182  ;;  %v1793_v47 = vpop.permute.xlu0 %1792 }
 0x1fb   : > { %1270 = vst.msk [vmem:[#allocation2 + $0x48] sm:$0xff] %vm1260_vm6, %v1183_v51 }
 0x1fc   : > { %1866 = vst.msk [vmem:[#allocation2 + $0xb8] sm:$0xff] %vm1842_vm9, %v1793_v47  ;;  %1804 = vrot.lane.b32.xlu1 %v2549_v0, %s2871_s9 }
 0x1fd   : > { %1772 = vrot.lane.b32.xlu0 %v2533_v53, %s2871_s9 }
 0x1fe   : > { %v1377_v28 = vpop.permute.xlu1 %1376  ;;  %v1882_v57 = vld [vmem:[#allocation2 + $0x38] sm:$0xff] }
 0x1ff   : > { %v1215_v19 = vpop.permute.xlu0 %1214  ;;  %1465 = vst.msk [vmem:[#allocation2 + $0x40] sm:$0xff] %vm1456_vm7, %v1377_v28  ;;  %2649 = vmatmul.mubr.f32.gmra.mxu0 %v1882_v57  ;;  %v3986_v28 = vld [vmem:[%s4145_s2] ss:$0 sm:$0xff] }
 0x200   : > { %1286 = vst.msk [vmem:[#allocation2 + $0xc8] sm:$0xff] %vm1260_vm6, %v1215_v19  ;;  %1226 = vrot.lane.b32.xlu1 %v2549_v0, %s2868_s10 }
 0x201   : > { %1194 = vrot.lane.b32.xlu0 %v2533_v53, %s2868_s10 }
 0x202   : > { %v1379_v56 = vpop.permute.xlu1 %1378 }
 0x203   : > { %v1409_v58 = vpop.permute.xlu0 %1408  ;;  %v1898_v30 = vld [vmem:[#allocation2 + $0xb8] sm:$0xff]  ;;  %1466 = vst.msk [vmem:[#allocation2 + $0x48] sm:$0xff] %vm1456_vm7, %v1379_v56 }
 0x204   : > { %1481 = vst.msk [vmem:[#allocation2 + $0xc0] sm:$0xff] %vm1456_vm7, %v1409_v58  ;;  %2673 = vmatmul.mubr.f32.gmra.mxu1 %v1898_v30  ;;  %1420 = vrot.lane.b32.xlu1 %v2486_v27, %s2869_s29 }
 0x205   : > { %1388 = vrot.lane.b32.xlu0 %v2470_v50, %s2869_s29 }
 0x206   : > { %v1570_v29 = vpop.permute.xlu1 %1569 }
 0x207   : > { %v1411_v1 = vpop.permute.xlu0 %1410  ;;  %1658 = vst.msk [vmem:[#allocation2 + $0x40] sm:$0xff] %vm1649_vm8, %v1570_v29 }
 0x208   : > { %1482 = vst.msk [vmem:[#allocation2 + $0xc8] sm:$0xff] %vm1456_vm7, %v1411_v1  ;;  %1422 = vrot.lane.b32.xlu1 %v2487_v18, %s2869_s29 }
 0x209   : > { %1390 = vrot.lane.b32.xlu0 %v2471_v49, %s2869_s29  ;;  %s2358_s29 = sshll.u32 %s208_s30, 8 }
 0x20a   : > { %v1024_v55 = vpop.permute.xlu1 %1023 }
 0x20b   : > { %v1602_v23 = vpop.permute.xlu0 %1601  ;;  %1094 = vst.msk [vmem:[#allocation2 + $0xd0] sm:$0xff] %vm1067_vm5, %v1024_v55 }
 0x20c   : > { %1674 = vst.msk [vmem:[#allocation2 + $0xc0] sm:$0xff] %vm1649_vm8, %v1602_v23  ;;  %1613 = vrot.lane.b32.xlu1 %v2518_v3, %s2870_s19 }
 0x20d   : > { %1581 = vrot.lane.b32.xlu0 %v2502_v24, %s2870_s19 }
 0x20e   : > { %v1604_v41 = vpop.permute.xlu1 %1603 }
 0x20f   : > { %v1572_v33 = vpop.permute.xlu0 %1571  ;;  %1675 = vst.msk [vmem:[#allocation2 + $0xc8] sm:$0xff] %vm1649_vm8, %v1604_v41 }
 0x210   : > { %1659 = vst.msk [vmem:[#allocation2 + $0x48] sm:$0xff] %vm1649_vm8, %v1572_v33  ;;  %1615 = vrot.lane.b32.xlu1 %v2519_v42, %s2870_s19 }
 0x211   : > { %1583 = vrot.lane.b32.xlu0 %v2503_v32, %s2870_s19  ;;  %s3996_s19 = scalar_lea.vmem [#allocation3], %s2358_s29 }
 0x212   : > { %v1795_v8 = vpop.permute.xlu1 %1794  ;;  %s2237_s8 = sshll.u32 %s3996_s19, 4  ;;  %s4091_s8 = int_to_ptr.vmem [resolvable:$true] %s2237_s8 }
 0x213   : > { %v1763_v9 = vpop.permute.xlu0 %1762  ;;  %1867 = vst.msk [vmem:[#allocation2 + $0xc0] sm:$0xff] %vm1842_vm9, %v1795_v8  ;;  %s2785_s21 = scalar_lea.vmem %s4091_s8, 4096  ;;  %p2792_p1 = scmp.lt.s32.totalorder %s4091_s8, %s2790_s26 }
 0x214   : > { %1851 = vst.msk [vmem:[#allocation2 + $0x40] sm:$0xff] %vm1842_vm9, %v1763_v9  ;;  %1806 = vrot.lane.b32.xlu1 %v2550_v7, %s2871_s9  ;;  %p2786_p12 = scmp.ne.s32.totalorder %s4091_s8, %s2785_s21  ;;  %p2793_p2 = scmp.lt.s32.totalorder %s2791_s27, %s2785_s21 }
 0x215   : > { %1774 = vrot.lane.b32.xlu0 %v2534_v52, %s2871_s9 }
 0x216   : > { %v1026_v12 = vpop.permute.xlu1 %1025  ;;  %p2787_p13 = pnand %p2786_p12, %p2934_p4  ;;  %p2794_p3 = por %p2793_p2, %p2792_p1 }
 0x217   : > { %v994_v16 = vpop.permute.xlu0 %993  ;;  %1095 = vst.msk [vmem:[#allocation2 + $0xd8] sm:$0xff] %vm1067_vm5, %v1026_v12 }
 0x218   : > { %1079 = vst.msk [vmem:[#allocation2 + $0x58] sm:$0xff] %vm1067_vm5, %v994_v16  ;;  %1808 = vrot.lane.b32.xlu1 %v2551_v10, %s2871_s9  ;;  %p2788_p0 = pneg %p2787_p13 }
 0x219   : > { %1776 = vrot.lane.b32.xlu0 %v2535_v11, %s2871_s9 }
 0x21a   : > { %v1217_v44 = vpop.permute.xlu1 %1216  ;;  %v1899_v15 = vld [vmem:[#allocation2 + $0xc0] sm:$0xff]  ;;  %p2795_p5 = pnand %p2794_p3, %p2788_p0 }
 0x21b   : > { %v1185_v34 = vpop.permute.xlu0 %1184  ;;  %v1883_v43 = vld [vmem:[#allocation2 + $0x40] sm:$0xff]  ;;  %1287 = vst.msk [vmem:[#allocation2 + $0xd0] sm:$0xff] %vm1260_vm6, %v1217_v44  ;;  %2675 = vmatprep.mubr.f32.mxu1 %v1899_v15 }
 0x21c   : > { %1271 = vst.msk [vmem:[#allocation2 + $0x50] sm:$0xff] %vm1260_vm6, %v1185_v34  ;;  %2651 = vmatprep.mubr.f32.mxu0 %v1883_v43 }
 0x21e   : > { %v1797_v35 = vpop.permute.xlu1 %1796 }
 0x21f   : > { %v1765_v14 = vpop.permute.xlu0 %1764  ;;  %1868 = vst.msk [vmem:[#allocation2 + $0xc8] sm:$0xff] %vm1842_vm9, %v1797_v35 }
 0x220   : > { %1852 = vst.msk [vmem:[#allocation2 + $0x48] sm:$0xff] %vm1842_vm9, %v1765_v14 }
 0x222   : > { %v1219_v31 = vpop.permute.xlu1 %1218 }
 0x223   : > { %v1187_v36 = vpop.permute.xlu0 %1186  ;;  %1288 = vst.msk [vmem:[#allocation2 + $0xd8] sm:$0xff] %vm1260_vm6, %v1219_v31 }
 0x224   : > { %1272 = vst.msk [vmem:[#allocation2 + $0x58] sm:$0xff] %vm1260_vm6, %v1187_v36 }
 0x226   : > { %v1413_v54 = vpop.permute.xlu1 %1412  ;;  %v1900_v21 = vld [vmem:[#allocation2 + $0xc8] sm:$0xff] }
 0x227   : > { %v1381_v37 = vpop.permute.xlu0 %1380  ;;  %v1884_v26 = vld [vmem:[#allocation2 + $0x48] sm:$0xff]  ;;  %1483 = vst.msk [vmem:[#allocation2 + $0xd0] sm:$0xff] %vm1456_vm7, %v1413_v54  ;;  %2676 = vmatmul.mubr.f32.gmra.mxu1 %v1900_v21 }
 0x228   : > { %1467 = vst.msk [vmem:[#allocation2 + $0x50] sm:$0xff] %vm1456_vm7, %v1381_v37  ;;  %2652 = vmatmul.mubr.f32.gmra.mxu0 %v1884_v26 }
 0x22a   : > { %v1415_v25 = vpop.permute.xlu1 %1414 }
 0x22b   : > { %v1383_v4 = vpop.permute.xlu0 %1382  ;;  %1484 = vst.msk [vmem:[#allocation2 + $0xd8] sm:$0xff] %vm1456_vm7, %v1415_v25 }
 0x22c   : > { %1468 = vst.msk [vmem:[#allocation2 + $0x58] sm:$0xff] %vm1456_vm7, %v1383_v4 }
 0x22e   : > { %v1606_v46 = vpop.permute.xlu1 %1605 }
 0x22f   : > { %v1574_v38 = vpop.permute.xlu0 %1573  ;;  %1676 = vst.msk [vmem:[#allocation2 + $0xd0] sm:$0xff] %vm1649_vm8, %v1606_v46 }
 0x230   : > { %1660 = vst.msk [vmem:[#allocation2 + $0x50] sm:$0xff] %vm1649_vm8, %v1574_v38 }
 0x232   : > { %v1028_v20 = vpop.permute.xlu1 %1027 }
 0x233   : > { %v996_v40 = vpop.permute.xlu0 %995  ;;  %1096 = vst.msk [vmem:[#allocation2 + $0xe0] sm:$0xff] %vm1067_vm5, %v1028_v20 }
 0x234   : > { %1080 = vst.msk [vmem:[#allocation2 + $0x60] sm:$0xff] %vm1067_vm5, %v996_v40 }
 0x236   : > { %v1608_v59 = vpop.permute.xlu1 %1607 }
 0x237   : > { %v1576_v45 = vpop.permute.xlu0 %1575  ;;  %1677 = vst.msk [vmem:[#allocation2 + $0xd8] sm:$0xff] %vm1649_vm8, %v1608_v59 }
 0x238   : > { %1661 = vst.msk [vmem:[#allocation2 + $0x58] sm:$0xff] %vm1649_vm8, %v1576_v45 }
 0x23a   : > { %v1799_v60 = vpop.permute.xlu1 %1798 }
 0x23b   : > { %v1767_v6 = vpop.permute.xlu0 %1766  ;;  %1869 = vst.msk [vmem:[#allocation2 + $0xd0] sm:$0xff] %vm1842_vm9, %v1799_v60 }
 0x23c   : > { %1853 = vst.msk [vmem:[#allocation2 + $0x50] sm:$0xff] %vm1842_vm9, %v1767_v6 }
 0x23e   : > { %v1030_v39 = vpop.permute.xlu1 %1029 }
 0x23f   : > { %v998_v13 = vpop.permute.xlu0 %997  ;;  %1097 = vst.msk [vmem:[#allocation2 + $0xe8] sm:$0xff] %vm1067_vm5, %v1030_v39 }
 0x240   : > { %1081 = vst.msk [vmem:[#allocation2 + $0x68] sm:$0xff] %vm1067_vm5, %v998_v13 }
 0x242   : > { %v1221_v17 = vpop.permute.xlu1 %1220  ;;  %v1901_v62 = vld [vmem:[#allocation2 + $0xd0] sm:$0xff] }
 0x243   : > { %v1189_v48 = vpop.permute.xlu0 %1188  ;;  %v1885_v61 = vld [vmem:[#allocation2 + $0x50] sm:$0xff]  ;;  %1289 = vst.msk [vmem:[#allocation2 + $0xe0] sm:$0xff] %vm1260_vm6, %v1221_v17  ;;  %2678 = vmatprep.mubr.f32.mxu1 %v1901_v62 }
 0x244   : > { %1273 = vst.msk [vmem:[#allocation2 + $0x60] sm:$0xff] %vm1260_vm6, %v1189_v48  ;;  %2654 = vmatprep.mubr.f32.mxu0 %v1885_v61 }
 0x246   : > { %v1801_v5 = vpop.permute.xlu1 %1800 }
 0x247   : > { %v1769_v2 = vpop.permute.xlu0 %1768  ;;  %1870 = vst.msk [vmem:[#allocation2 + $0xd8] sm:$0xff] %vm1842_vm9, %v1801_v5 }
 0x248   : > { %1854 = vst.msk [vmem:[#allocation2 + $0x58] sm:$0xff] %vm1842_vm9, %v1769_v2 }
 0x24a   : > { %v1223_v22 = vpop.permute.xlu1 %1222 }
 0x24b   : > { %v1191_v63 = vpop.permute.xlu0 %1190  ;;  %1290 = vst.msk [vmem:[#allocation2 + $0xe8] sm:$0xff] %vm1260_vm6, %v1223_v22 }
 0x24c   : > { %1274 = vst.msk [vmem:[#allocation2 + $0x68] sm:$0xff] %vm1260_vm6, %v1191_v63 }
 0x24e   : > { %v1417_v0 = vpop.permute.xlu1 %1416  ;;  %v1902_v47 = vld [vmem:[#allocation2 + $0xd8] sm:$0xff] }
 0x24f   : > { %v1385_v53 = vpop.permute.xlu0 %1384  ;;  %v1886_v51 = vld [vmem:[#allocation2 + $0x58] sm:$0xff]  ;;  %1485 = vst.msk [vmem:[#allocation2 + $0xe0] sm:$0xff] %vm1456_vm7, %v1417_v0  ;;  %2679 = vmatmul.mubr.f32.gmra.mxu1 %v1902_v47 }
 0x250   : > { %1469 = vst.msk [vmem:[#allocation2 + $0x60] sm:$0xff] %vm1456_vm7, %v1385_v53  ;;  %2655 = vmatmul.mubr.f32.gmra.mxu0 %v1886_v51 }
 0x252   : > { %v1419_v19 = vpop.permute.xlu1 %1418 }
 0x253   : > { %v1387_v57 = vpop.permute.xlu0 %1386  ;;  %1486 = vst.msk [vmem:[#allocation2 + $0xe8] sm:$0xff] %vm1456_vm7, %v1419_v19  ;;  %v2641_v27 = vpop.f32.mrf.mxu0 }
 0x254   : > { %1470 = vst.msk [vmem:[#allocation2 + $0x68] sm:$0xff] %vm1456_vm7, %v1387_v57  ;;  %v2002_v50 = vadd.f32 %v2641_v27, %v3986_v28 }
 0x255   : > { %v1996_v56 = vpop.f32.mrf.mxu0 }
 0x256   : > { %v2156_v58 = vmax.f32 %v2002_v50, 0.0  ;;  %v1997_v30 = vadd.f32 %v3986_v28, %v1996_v56  ;;  %v1610_v18 = vpop.permute.xlu1 %1609 }
 0x257   : > { %v1578_v49 = vpop.permute.xlu0 %1577  ;;  %1678 = vst.msk [vmem:[#allocation2 + $0xe0] sm:$0xff] %vm1649_vm8, %v1610_v18 }
 0x258   : > { %1662 = vst.msk [vmem:[#allocation2 + $0x60] sm:$0xff] %vm1649_vm8, %v1578_v49  ;;  %v2665_v29 = vpop.f32.mrf.mxu1  ;;  %2188 = vst [vmem:[%s3996_s19 + $0x8] sm:$0xff] %v2156_v58  ;;  %v2155_v1 = vmax.f32 %v1997_v30, 0.0 }
 0x259   : > { %v2082_v3 = vadd.f32 %v2665_v29, %v3986_v28 }
 0x25a   : > { %v2076_v24 = vpop.f32.mrf.mxu1  ;;  %2187 = vst [vmem:[%s3996_s19] sm:$0xff] %v2155_v1  ;;  %v1032_v42 = vpop.permute.xlu1 %1031 }
 0x25b   : > { %v2172_v55 = vmax.f32 %v2082_v3, 0.0  ;;  %v2077_v23 = vadd.f32 %v3986_v28, %v2076_v24  ;;  %v1000_v32 = vpop.permute.xlu0 %999  ;;  %1098 = vst.msk [vmem:[#allocation2 + $0xf0] sm:$0xff] %vm1067_vm5, %v1032_v42 }
 0x25c   : > { %1082 = vst.msk [vmem:[#allocation2 + $0x70] sm:$0xff] %vm1067_vm5, %v1000_v32 }
 0x25d   : > { %2204 = vst [vmem:[%s3996_s19 + $0x88] sm:$0xff] %v2172_v55  ;;  %v2171_v41 = vmax.f32 %v2077_v23, 0.0 }
 0x25e   : > { %v1612_v33 = vpop.permute.xlu1 %1611 }
 0x25f   : > { %2203 = vst [vmem:[%s3996_s19 + $0x80] sm:$0xff] %v2171_v41  ;;  %v1580_v7 = vpop.permute.xlu0 %1579  ;;  %1679 = vst.msk [vmem:[#allocation2 + $0xe8] sm:$0xff] %vm1649_vm8, %v1612_v33 }
 0x260   : > { %1663 = vst.msk [vmem:[#allocation2 + $0x68] sm:$0xff] %vm1649_vm8, %v1580_v7 }
 0x262   : > { %v1803_v52 = vpop.permute.xlu1 %1802 }
 0x263   : > { %v1771_v8 = vpop.permute.xlu0 %1770  ;;  %1871 = vst.msk [vmem:[#allocation2 + $0xe0] sm:$0xff] %vm1842_vm9, %v1803_v52 }
 0x264   : > { %1855 = vst.msk [vmem:[#allocation2 + $0x60] sm:$0xff] %vm1842_vm9, %v1771_v8 }
 0x266   : > { %v1034_v9 = vpop.permute.xlu1 %1033 }
 0x267   : > { %v1002_v10 = vpop.permute.xlu0 %1001  ;;  %1099 = vst.msk [vmem:[#allocation2 + $0xf8] sm:$0xff] %vm1067_vm5, %v1034_v9 }
 0x268   : > { %1083 = vst.msk [vmem:[#allocation2 + $0x78] sm:$0xff] %vm1067_vm5, %v1002_v10 }
 0x26a   : > { %v1225_v11 = vpop.permute.xlu1 %1224  ;;  %v1903_v44 = vld [vmem:[#allocation2 + $0xe0] sm:$0xff] }
 0x26b   : > { %v1193_v12 = vpop.permute.xlu0 %1192  ;;  %v1887_v16 = vld [vmem:[#allocation2 + $0x60] sm:$0xff]  ;;  %1291 = vst.msk [vmem:[#allocation2 + $0xf0] sm:$0xff] %vm1260_vm6, %v1225_v11  ;;  %2681 = vmatprep.mubr.f32.mxu1 %v1903_v44 }
 0x26c   : > { %1275 = vst.msk [vmem:[#allocation2 + $0x70] sm:$0xff] %vm1260_vm6, %v1193_v12  ;;  %2657 = vmatprep.mubr.f32.mxu0 %v1887_v16 }
 0x26e   : > { %v1805_v34 = vpop.permute.xlu1 %1804 }
 0x26f   : > { %v1773_v43 = vpop.permute.xlu0 %1772  ;;  %1872 = vst.msk [vmem:[#allocation2 + $0xe8] sm:$0xff] %vm1842_vm9, %v1805_v34 }
 0x270   : > { %1856 = vst.msk [vmem:[#allocation2 + $0x68] sm:$0xff] %vm1842_vm9, %v1773_v43 }
 0x272   : > { %v1227_v15 = vpop.permute.xlu1 %1226 }
 0x273   : > { %v1195_v35 = vpop.permute.xlu0 %1194  ;;  %1292 = vst.msk [vmem:[#allocation2 + $0xf8] sm:$0xff] %vm1260_vm6, %v1227_v15 }
 0x274   : > { %1276 = vst.msk [vmem:[#allocation2 + $0x78] sm:$0xff] %vm1260_vm6, %v1195_v35 }
 0x276   : > { %v1421_v14 = vpop.permute.xlu1 %1420  ;;  %v1904_v54 = vld [vmem:[#allocation2 + $0xe8] sm:$0xff] }
 0x277   : > { %v1389_v31 = vpop.permute.xlu0 %1388  ;;  %v1888_v36 = vld [vmem:[#allocation2 + $0x68] sm:$0xff]  ;;  %1487 = vst.msk [vmem:[#allocation2 + $0xf0] sm:$0xff] %vm1456_vm7, %v1421_v14  ;;  %v2644_v37 = vpop.f32.mrf.mxu0  ;;  %2682 = vmatmul.mubr.f32.gmra.mxu1 %v1904_v54 }
 0x278   : > { %1471 = vst.msk [vmem:[#allocation2 + $0x70] sm:$0xff] %vm1456_vm7, %v1389_v31  ;;  %2658 = vmatmul.mubr.f32.gmra.mxu0 %v1888_v36  ;;  %v2012_v26 = vadd.f32 %v2644_v37, %v3986_v28 }
 0x279   : > { %v2006_v21 = vpop.f32.mrf.mxu0 }
 0x27a   : > { %v2158_v25 = vmax.f32 %v2012_v26, 0.0  ;;  %v2007_v4 = vadd.f32 %v3986_v28, %v2006_v21  ;;  %v1423_v46 = vpop.permute.xlu1 %1422 }
 0x27b   : > { %v1391_v38 = vpop.permute.xlu0 %1390  ;;  %1488 = vst.msk [vmem:[#allocation2 + $0xf8] sm:$0xff] %vm1456_vm7, %v1423_v46 }
 0x27c   : > { %1472 = vst.msk [vmem:[#allocation2 + $0x78] sm:$0xff] %vm1456_vm7, %v1391_v38  ;;  %v2668_v20 = vpop.f32.mrf.mxu1  ;;  %2190 = vst [vmem:[%s3996_s19 + $0x18] sm:$0xff] %v2158_v25  ;;  %v2157_v40 = vmax.f32 %v2007_v4, 0.0 }
 0x27d   : > { %v2092_v59 = vadd.f32 %v2668_v20, %v3986_v28 }
 0x27e   : > { %v2086_v45 = vpop.f32.mrf.mxu1  ;;  %2189 = vst [vmem:[%s3996_s19 + $0x10] sm:$0xff] %v2157_v40  ;;  %v1614_v39 = vpop.permute.xlu1 %1613 }
 0x27f   : > { %v2174_v60 = vmax.f32 %v2092_v59, 0.0  ;;  %v2087_v6 = vadd.f32 %v3986_v28, %v2086_v45  ;;  %v1582_v13 = vpop.permute.xlu0 %1581  ;;  %1680 = vst.msk [vmem:[#allocation2 + $0xf0] sm:$0xff] %vm1649_vm8, %v1614_v39 }
 0x280   : > { %1664 = vst.msk [vmem:[#allocation2 + $0x70] sm:$0xff] %vm1649_vm8, %v1582_v13 }
 0x281   : > { %2206 = vst [vmem:[%s3996_s19 + $0x98] sm:$0xff] %v2174_v60  ;;  %v2173_v17 = vmax.f32 %v2087_v6, 0.0 }
 0x282   : > { %v1616_v48 = vpop.permute.xlu1 %1615 }
 0x283   : > { %2205 = vst [vmem:[%s3996_s19 + $0x90] sm:$0xff] %v2173_v17  ;;  %v1584_v61 = vpop.permute.xlu0 %1583  ;;  %1681 = vst.msk [vmem:[#allocation2 + $0xf8] sm:$0xff] %vm1649_vm8, %v1616_v48 }
 0x284   : > { %1665 = vst.msk [vmem:[#allocation2 + $0x78] sm:$0xff] %vm1649_vm8, %v1584_v61 }
 0x286   : > { %v1807_v62 = vpop.permute.xlu1 %1806 }
 0x287   : > { %v1775_v5 = vpop.permute.xlu0 %1774  ;;  %1873 = vst.msk [vmem:[#allocation2 + $0xf0] sm:$0xff] %vm1842_vm9, %v1807_v62 }
 0x288   : > { %1857 = vst.msk [vmem:[#allocation2 + $0x70] sm:$0xff] %vm1842_vm9, %v1775_v5 }
 0x28a   : > { %v1809_v2 = vpop.permute.xlu1 %1808 }
 0x28b   : > { %v1777_v22 = vpop.permute.xlu0 %1776  ;;  %1874 = vst.msk [vmem:[#allocation2 + $0xf8] sm:$0xff] %vm1842_vm9, %v1809_v2 }
 0x28c   : > { %1858 = vst.msk [vmem:[#allocation2 + $0x78] sm:$0xff] %vm1842_vm9, %v1777_v22 }
 0x28e   : > { %v1905_v0 = vld [vmem:[#allocation2 + $0xf0] sm:$0xff] }
 0x28f   : > { %v1889_v63 = vld [vmem:[#allocation2 + $0x70] sm:$0xff]  ;;  %2684 = vmatprep.mubr.f32.mxu1 %v1905_v0 }
 0x290   : > { %2660 = vmatprep.mubr.f32.mxu0 %v1889_v63 }
 0x292   : > { %v1906_v51 = vld [vmem:[#allocation2 + $0xf8] sm:$0xff] }
 0x293   : > { %v1890_v53 = vld [vmem:[#allocation2 + $0x78] sm:$0xff]  ;;  %2685 = vmatmul.mubr.f32.gmra.mxu1 %v1906_v51 }
 0x294   : > { %2661 = vmatmul.mubr.f32.gmra.mxu0 %v1890_v53 }
 0x29b   : > { %v2647_v47 = vpop.f32.mrf.mxu0 }
 0x29c   : > { %v2022_v19 = vadd.f32 %v2647_v47, %v3986_v28 }
 0x29d   : > { %v2016_v57 = vpop.f32.mrf.mxu0 }
 0x29e   : > { %v2160_v27 = vmax.f32 %v2022_v19, 0.0  ;;  %v2017_v50 = vadd.f32 %v3986_v28, %v2016_v57 }
 0x2a0   : > { %v2671_v56 = vpop.f32.mrf.mxu1  ;;  %2192 = vst [vmem:[%s3996_s19 + $0x28] sm:$0xff] %v2160_v27  ;;  %v2159_v58 = vmax.f32 %v2017_v50, 0.0 }
 0x2a1   : > { %v2102_v30 = vadd.f32 %v2671_v56, %v3986_v28 }
 0x2a2   : > { %v2096_v18 = vpop.f32.mrf.mxu1  ;;  %2191 = vst [vmem:[%s3996_s19 + $0x20] sm:$0xff] %v2159_v58 }
 0x2a3   : > { %v2176_v49 = vmax.f32 %v2102_v30, 0.0  ;;  %v2097_v29 = vadd.f32 %v3986_v28, %v2096_v18 }
 0x2a5   : > { %2208 = vst [vmem:[%s3996_s19 + $0xa8] sm:$0xff] %v2176_v49  ;;  %v2175_v1 = vmax.f32 %v2097_v29, 0.0 }
 0x2a7   : > { %2207 = vst [vmem:[%s3996_s19 + $0xa0] sm:$0xff] %v2175_v1 }
 0x2bf   : > { %v2650_v3 = vpop.f32.mrf.mxu0 }
 0x2c0   : > { %v2032_v24 = vadd.f32 %v2650_v3, %v3986_v28 }
 0x2c1   : > { %v2026_v55 = vpop.f32.mrf.mxu0 }
 0x2c2   : > { %v2162_v23 = vmax.f32 %v2032_v24, 0.0  ;;  %v2027_v42 = vadd.f32 %v3986_v28, %v2026_v55 }
 0x2c4   : > { %v2674_v32 = vpop.f32.mrf.mxu1  ;;  %2194 = vst [vmem:[%s3996_s19 + $0x38] sm:$0xff] %v2162_v23  ;;  %v2161_v41 = vmax.f32 %v2027_v42, 0.0 }
 0x2c5   : > { %v2112_v33 = vadd.f32 %v2674_v32, %v3986_v28 }
 0x2c6   : > { %v2106_v7 = vpop.f32.mrf.mxu1  ;;  %2193 = vst [vmem:[%s3996_s19 + $0x30] sm:$0xff] %v2161_v41 }
 0x2c7   : > { %v2178_v52 = vmax.f32 %v2112_v33, 0.0  ;;  %v2107_v8 = vadd.f32 %v3986_v28, %v2106_v7 }
 0x2c9   : > { %2210 = vst [vmem:[%s3996_s19 + $0xb8] sm:$0xff] %v2178_v52  ;;  %v2177_v9 = vmax.f32 %v2107_v8, 0.0 }
 0x2cb   : > { %2209 = vst [vmem:[%s3996_s19 + $0xb0] sm:$0xff] %v2177_v9 }
 0x2e7   : > { %v2677_v11 = vpop.f32.mrf.mxu1 }
 0x2e8   : > { %v2653_v10 = vpop.f32.mrf.mxu0  ;;  %v2122_v16 = vadd.f32 %v2677_v11, %v3986_v28 }
 0x2e9   : > { %v2042_v12 = vadd.f32 %v2653_v10, %v3986_v28  ;;  %v2116_v34 = vpop.f32.mrf.mxu1 }
 0x2ea   : > { %v2036_v44 = vpop.f32.mrf.mxu0  ;;  %v2180_v15 = vmax.f32 %v2122_v16, 0.0  ;;  %v2117_v14 = vadd.f32 %v3986_v28, %v2116_v34 }
 0x2eb   : > { %v2164_v43 = vmax.f32 %v2042_v12, 0.0  ;;  %v2037_v35 = vadd.f32 %v3986_v28, %v2036_v44 }
 0x2ec   : > { %2212 = vst [vmem:[%s3996_s19 + $0xc8] sm:$0xff] %v2180_v15  ;;  %v2179_v36 = vmax.f32 %v2117_v14, 0.0 }
 0x2ed   : > { %2196 = vst [vmem:[%s3996_s19 + $0x48] sm:$0xff] %v2164_v43  ;;  %v2163_v31 = vmax.f32 %v2037_v35, 0.0 }
 0x2ee   : > { %2211 = vst [vmem:[%s3996_s19 + $0xc0] sm:$0xff] %v2179_v36 }
 0x2ef   : > { %2195 = vst [vmem:[%s3996_s19 + $0x40] sm:$0xff] %v2163_v31 }
 0x30f   : > { %v2680_v37 = vpop.f32.mrf.mxu1 }
 0x310   : > { %v2656_v54 = vpop.f32.mrf.mxu0  ;;  %v2132_v21 = vadd.f32 %v2680_v37, %v3986_v28 }
 0x311   : > { %v2052_v26 = vadd.f32 %v2656_v54, %v3986_v28  ;;  %v2126_v4 = vpop.f32.mrf.mxu1 }
 0x312   : > { %v2046_v25 = vpop.f32.mrf.mxu0  ;;  %v2182_v38 = vmax.f32 %v2132_v21, 0.0  ;;  %v2127_v40 = vadd.f32 %v3986_v28, %v2126_v4 }
 0x313   : > { %v2166_v46 = vmax.f32 %v2052_v26, 0.0  ;;  %v2047_v20 = vadd.f32 %v3986_v28, %v2046_v25 }
 0x314   : > { %2214 = vst [vmem:[%s3996_s19 + $0xd8] sm:$0xff] %v2182_v38  ;;  %v2181_v45 = vmax.f32 %v2127_v40, 0.0 }
 0x315   : > { %2198 = vst [vmem:[%s3996_s19 + $0x58] sm:$0xff] %v2166_v46  ;;  %v2165_v59 = vmax.f32 %v2047_v20, 0.0 }
 0x316   : > { %2213 = vst [vmem:[%s3996_s19 + $0xd0] sm:$0xff] %v2181_v45 }
 0x317   : > { %2197 = vst [vmem:[%s3996_s19 + $0x50] sm:$0xff] %v2165_v59 }
 0x337   : > { %v2683_v6 = vpop.f32.mrf.mxu1 }
 0x338   : > { %v2659_v60 = vpop.f32.mrf.mxu0  ;;  %v2142_v13 = vadd.f32 %v2683_v6, %v3986_v28 }
 0x339   : > { %v2062_v39 = vadd.f32 %v2659_v60, %v3986_v28  ;;  %v2136_v48 = vpop.f32.mrf.mxu1 }
 0x33a   : > { %v2056_v17 = vpop.f32.mrf.mxu0  ;;  %v2184_v62 = vmax.f32 %v2142_v13, 0.0  ;;  %v2137_v2 = vadd.f32 %v3986_v28, %v2136_v48 }
 0x33b   : > { %v2168_v61 = vmax.f32 %v2062_v39, 0.0  ;;  %v2057_v5 = vadd.f32 %v3986_v28, %v2056_v17 }
 0x33c   : > { %2216 = vst [vmem:[%s3996_s19 + $0xe8] sm:$0xff] %v2184_v62  ;;  %v2183_v63 = vmax.f32 %v2137_v2, 0.0 }
 0x33d   : > { %2200 = vst [vmem:[%s3996_s19 + $0x68] sm:$0xff] %v2168_v61  ;;  %v2167_v22 = vmax.f32 %v2057_v5, 0.0 }
 0x33e   : > { %2215 = vst [vmem:[%s3996_s19 + $0xe0] sm:$0xff] %v2183_v63 }
 0x33f   : > { %2199 = vst [vmem:[%s3996_s19 + $0x60] sm:$0xff] %v2167_v22 }
 0x353   : > { %v2686_v53 = vpop.f32.mrf.mxu1 }
 0x354   : > { %v2662_v0 = vpop.f32.mrf.mxu0  ;;  %v2152_v47 = vadd.f32 %v2686_v53, %v3986_v28 }
 0x355   : > { %v2072_v51 = vadd.f32 %v2662_v0, %v3986_v28  ;;  %v2146_v57 = vpop.f32.mrf.mxu1 }
 0x356   : > { %v2066_v19 = vpop.f32.mrf.mxu0  ;;  %v2186_v50 = vmax.f32 %v2152_v47, 0.0  ;;  %v2147_v58 = vadd.f32 %v3986_v28, %v2146_v57 }
 0x357   : > { %v2170_v27 = vmax.f32 %v2072_v51, 0.0  ;;  %v2067_v56 = vadd.f32 %v3986_v28, %v2066_v19 }
 0x358   : > { %2218 = vst [vmem:[%s3996_s19 + $0xf8] sm:$0xff] %v2186_v50  ;;  %v2185_v18 = vmax.f32 %v2147_v58, 0.0 }
 0x359   : > { %2202 = vst [vmem:[%s3996_s19 + $0x78] sm:$0xff] %v2170_v27  ;;  %v2169_v30 = vmax.f32 %v2067_v56, 0.0 }
 0x35a   : > { %2217 = vst [vmem:[%s3996_s19 + $0xf0] sm:$0xff] %v2185_v18 }
 0x35b   : > { %2201 = vst [vmem:[%s3996_s19 + $0x70] sm:$0xff] %v2169_v30 }
 0x35c   : > { %2798 = shalt.err (!%p2795_p5)
}
 0x35d   : > { %s2799_s28 = scalar_lea.hbm %s4087_s18, 4096  ;;  %s2803_s7 = scalar_lea.hbm %s4146_s3, 8192 }
 0x35e   : > { %p2800_p6 = scmp.ne.s32.totalorder %s4087_s18, %s2799_s28  ;;  %p2804_p10 = scmp.lt.s32.totalorder %s4087_s18, %s4146_s3 }
 0x35f   : > { %p2805_p11 = scmp.lt.s32.totalorder %s2803_s7, %s2799_s28 }
 0x360   : > { %p2801_p7 = pnand %p2800_p6, %p2934_p4 }
 0x361   : > { %p2806_p12 = por %p2805_p11, %p2804_p10 }
 0x362   : > { %p2802_p9 = pneg %p2801_p7 }
 0x364   : > { %p2807_p13 = pnand %p2806_p12, %p2802_p9 }
 0x366   : > { %2810 = shalt.err (!%p2807_p13)
}
 0x367   : > { %s2873_s19 = smov 128  }
 0x368   : > { %2720 = dma.vmem_to_hbm [thread:$0]  (%p2934_p4), %s4091_s8, 4096, %s4087_s18, %s4097_s15, %s2873_s19, %s2873_s19, %s2865_s5  }
 0x369 PF: > { %p2726_p0 = scmp.ge.s32.totalorder %s2861_s17, 2  ;;  %s2252_s6 = sand.u32 1, %s2841_s12  }
 0x36a   : > { %s2253_s9 = scalar_lea.sflag [#allocation4], %s2252_s6 }
 0x36b   : > { %p2723_p1 = pnand %p2726_p0, %p2941_p8 }
 0x36d   : > { %p2724_p2 = pneg %p2723_p1 }
 0x36f   : > { %2836 = dma.done.wait (%p2724_p2), %s2253_s9, 4096  }
 0x370   : > { %2838 = vsyncadd (%p2724_p2), %s2253_s9, 4294963200  ;;  %s16_s17 = sadd.s32 1, %s2861_s17   ;;  %s4168_s12 = smov %s2845_s13 }
 0x371   : > { %p13_p3 = scmp.ge.s32.totalorder %s16_s17, 4   ;;  %s4169_s13 = smov %s2849_s14 }
 0x372   : > { %s4170_s14 = smov %s2947_s25  ;;  %s4171_s15 = smov %s2857_s16 }
 0x373   : > { %s4172_s16 = smov %s4174_s20  ;;  %15 = sbr.rel (!%p13_p3) target bundleno = 4 (0x4), region = 76 }
 0x378   :  { %2258 = vsyncpa [#allocation4], 1 }
 0x379   :  { %2260 = vsyncpa [#allocation4 + $0x1], 1 }

</bundles_post_ra>
